<compile_context>
chip_gen: v7x
topology: tpu7x:2x2x1
jax: 0.10.0
libtpu: 0.0.40
codegen_flags: <defaults>
</compile_context>

<pallas_src>
import functools
import math

import jax
import jax.numpy as jnp
import numpy as np
from jax import lax
from jax.experimental import pallas as pl
from jax.experimental.pallas import tpu as pltpu


PARAM_ORDER = (
    "wq", "bq", "wk", "bk", "wv", "bv", "wo", "bo",
    "w1", "b1", "w2", "b2",
    "g1", "be1", "g2", "be2",
)


def _fast_recip(x):
    """EUP approximate reciprocal + one Newton step (keeps the divide off the VALU)."""
    r = pl.reciprocal(x, approx=True)
    return r * (2.0 - x * r)


def _encoder_stack_kernel(
    x_ref,
    wq_ref, bq_ref, wk_ref, bk_ref, wv_ref, bv_ref, wo_ref, bo_ref,
    w1_ref, b1_ref, w2_ref, b2_ref,
    g1_ref, be1_ref, g2_ref, be2_ref,
    out_ref, attn_ref,
    *, num_heads, eps,
):
    """One encoder layer for a (Bt, S, D) batch block; layer index = grid axis 1.

    The output ref (constant block index over the layer axis) carries the
    activation from layer l to layer l+1 entirely in VMEM.
    """
    layer = pl.program_id(1)
    num_layers = pl.num_programs(1)

    # First layer of this batch block: seed the carried activation with the input.
    @pl.when(layer == 0)
    def _():
        out_ref[...] = x_ref[...]

    x = out_ref[...].astype(jnp.float32)          # carried activation (Bt, S, D)
    Bt, S, D = x.shape
    head_dim = D // num_heads
    N = Bt * S
    scale = 1.0 / math.sqrt(head_dim)

    x2 = x.reshape(N, D)                          # merge leading dims (lane dim unchanged)

    wq = wq_ref[...]
    wk = wk_ref[...]
    wv = wv_ref[...]
    wo = wo_ref[...]

    # QKV projections as single large contractions over the whole batch block.
    q = jnp.dot(x2, wq, preferred_element_type=jnp.float32) + bq_ref[...]
    k = jnp.dot(x2, wk, preferred_element_type=jnp.float32) + bk_ref[...]
    v = jnp.dot(x2, wv, preferred_element_type=jnp.float32) + bv_ref[...]

    attn_out = jnp.zeros((N, D), jnp.float32)
    attn_w = jnp.zeros((Bt, S, S), jnp.float32)

    # Static head loop; each head does batched (over Bt) attention.
    # TODO(synk): for many heads / large S, fold (Bt, H) into one batched
    #             dot_general and move accumulators to VMEM scratch.
    for h in range(num_heads):
        sl = slice(h * head_dim, (h + 1) * head_dim)
        qh = (q[:, sl] * scale).reshape(Bt, S, head_dim)
        kh = k[:, sl].reshape(Bt, S, head_dim)
        vh = v[:, sl].reshape(Bt, S, head_dim)

        s = jnp.einsum("bqd,bkd->bqk", qh, kh,
                       preferred_element_type=jnp.float32)      # (Bt, S, S)
        s = s - jnp.max(s, axis=-1, keepdims=True)
        e = jnp.exp(s)
        denom = jnp.sum(e, axis=-1, keepdims=True)
        probs = e * _fast_recip(denom)
        attn_w = attn_w + probs

        ctx = jnp.einsum("bqk,bkd->bqd", probs, vh,
                         preferred_element_type=jnp.float32)    # (Bt, S, hd)
        # Fold this head's context straight through its rows of W_o
        # (algebraically identical to concat-heads @ W_o, no reshuffle needed).
        attn_out = attn_out + jnp.dot(ctx.reshape(N, head_dim), wo[sl, :],
                                      preferred_element_type=jnp.float32)

    attn_out = attn_out + bo_ref[...]

    def layer_norm(z, g, b):
        mu = jnp.mean(z, axis=-1, keepdims=True)
        zc = z - mu
        var = jnp.mean(zc * zc, axis=-1, keepdims=True)
        return zc * lax.rsqrt(var + eps) * g + b

    # Post-norm residual blocks (nn.TransformerEncoderLayer, eval mode).
    h1 = layer_norm(x2 + attn_out, g1_ref[...], be1_ref[...])
    ff = jnp.dot(h1, w1_ref[...], preferred_element_type=jnp.float32) + b1_ref[...]
    ff = jnp.maximum(ff, 0.0)                                    # ReLU
    ff = jnp.dot(ff, w2_ref[...], preferred_element_type=jnp.float32) + b2_ref[...]
    y = layer_norm(h1 + ff, g2_ref[...], be2_ref[...])

    out_ref[...] = y.reshape(Bt, S, D).astype(out_ref.dtype)

    # Only the LAST layer's (head-averaged) attention weights are emitted.
    @pl.when(layer == num_layers - 1)
    def _():
        attn_ref[...] = (attn_w * (1.0 / num_heads)).astype(attn_ref.dtype)


def _pick_batch_block(batch, max_bt=8):
    """Largest divisor of `batch` <= max_bt, keeping >= 2 grid blocks when possible
    so the 'parallel' batch axis can shard across v7x's two TensorCores."""
    divs = [d for d in range(1, min(batch, max_bt) + 1) if batch % d == 0]
    bt = max(divs)
    if batch >= 2 and bt == batch:
        smaller = [d for d in divs if d < batch]
        if smaller:
            bt = max(smaller)
    return bt


def _vmem_limit_bytes(bt, s, d, ff, itemsize):
    """Explicit VMEM budget: double-buffered blocks + f32 intermediates, clamped
    to v7x's 64 MiB/TC ceiling (also raises v5e's 16 MiB default when needed)."""
    act = bt * s * d * itemsize
    attn = bt * s * s * 4
    wts = (4 * d * d + 2 * d * ff + 9 * d + ff) * itemsize
    blocks = 2 * (2 * act + attn + wts)                 # pipeline double buffers
    interm = (8 * bt * s * max(d, ff) + 4 * bt * s * s) * 4
    est = blocks + interm + (2 << 20)
    return int(min(max(est, 8 << 20), 64 << 20))


def encoder_stack_forward(x, stacked, *, num_layers, num_heads, eps=1e-5,
                          max_batch_block=8):
    """x: (B, S, D); stacked params have a leading num_layers dim.
    Returns (y: (B, S, D), attn_last_layer: (B, S, S))."""
    B, S, D = x.shape
    assert D % num_heads == 0
    FF = stacked["w1"].shape[-1]
    Bt = _pick_batch_block(B, max_batch_block)
    plist = [stacked[name] for name in PARAM_ORDER]

    kernel = functools.partial(_encoder_stack_kernel,
                               num_heads=num_heads, eps=eps)

    def act_map(b, l):
        return (b, 0, 0)          # constant over the layer axis -> VMEM-resident

    def w_map(b, l):
        return (l, 0, 0)          # stream layer l's weights each step

    in_specs = [pl.BlockSpec((Bt, S, D), act_map)]
    for p in plist:
        in_specs.append(pl.BlockSpec((None,) + p.shape[1:], w_map))

    grid_spec = pltpu.PrefetchScalarGridSpec(
        num_scalar_prefetch=0,
        grid=(B // Bt, num_layers),
        in_specs=in_specs,
        out_specs=(
            pl.BlockSpec((Bt, S, D), act_map),
            pl.BlockSpec((Bt, S, S), act_map),
        ),
    )

    y, attn = pl.pallas_call(
        kernel,
        out_shape=(
            jax.ShapeDtypeStruct((B, S, D), x.dtype),
            jax.ShapeDtypeStruct((B, S, S), jnp.float32),
        ),
        grid_spec=grid_spec,
        compiler_params=pltpu.CompilerParams(
            dimension_semantics=("parallel", "arbitrary"),
            vmem_limit_bytes=_vmem_limit_bytes(Bt, S, D, FF, x.dtype.itemsize),
        ),
    )(x, *plist)
    return y, attn


class TransformerEncoder:
    """Mirror of the PyTorch module: a stack of cloned encoder layers; returns
    (output, attn_output_weights_of_last_layer)."""

    def __init__(self, layer_params, num_layers, num_heads):
        # _get_clones(deepcopy) semantics: every layer starts from the same params.
        self.layers = [layer_params for _ in range(num_layers)]
        # Stack per-layer params along a leading layer dim for the fused kernel.
        self.stacked = {k: jnp.stack([p[k] for p in self.layers])
                        for k in PARAM_ORDER}
        self.num_layers = num_layers
        self.num_heads = num_heads

    def __call__(self, src, mask=None, src_key_padding_mask=None):
        assert mask is None and src_key_padding_mask is None, \
            "masks not implemented"  # TODO(synk): attention masks
        # One (S,B,D) <-> (B,S,D) transpose pair per forward (amortized over all
        # layers); batch-major blocks keep the batched attention dots lowerable.
        x = jnp.transpose(src, (1, 0, 2))
        y, attn = encoder_stack_forward(x, self.stacked,
                                        num_layers=self.num_layers,
                                        num_heads=self.num_heads)
        return jnp.transpose(y, (1, 0, 2)), attn


# ----------------------- pure-JAX reference (for the check) -----------------------
def _ref_layer(x, p, num_heads, eps=1e-5):
    B, S, D = x.shape
    hd = D // num_heads
    q = x @ p["wq"] + p["bq"]
    k = x @ p["wk"] + p["bk"]
    v = x @ p["wv"] + p["bv"]

    def split(t):
        return t.reshape(B, S, num_heads, hd).transpose(0, 2, 1, 3)

    qh, kh, vh = split(q), split(k), split(v)
    s = jnp.einsum("bhqd,bhkd->bhqk", qh, kh) / math.sqrt(hd)
    pw = jax.nn.softmax(s, axis=-1)
    ctx = jnp.einsum("bhqk,bhkd->bhqd", pw, vh)
    ctx = ctx.transpose(0, 2, 1, 3).reshape(B, S, D)
    attn_out = ctx @ p["wo"] + p["bo"]
    attn_w = pw.mean(axis=1)

    def ln(z, g, b):
        mu = z.mean(-1, keepdims=True)
        zc = z - mu
        var = (zc * zc).mean(-1, keepdims=True)
        return zc * lax.rsqrt(var + eps) * g + b

    h1 = ln(x + attn_out, p["g1"], p["be1"])
    ff = jax.nn.relu(h1 @ p["w1"] + p["b1"]) @ p["w2"] + p["b2"]
    y = ln(h1 + ff, p["g2"], p["be2"])
    return y, attn_w


def _ref_encoder(src, layers, num_heads):
    x = jnp.transpose(src, (1, 0, 2))
    attn = None
    for p in layers:
        x, attn = _ref_layer(x, p, num_heads)
    return jnp.transpose(x, (1, 0, 2)), attn


def init_layer_params(key, d_model, dim_ff):
    ks = jax.random.split(key, 16)
    sd = 1.0 / math.sqrt(d_model)
    sf = 1.0 / math.sqrt(dim_ff)
    n = lambda k, shape, s: jax.random.normal(k, shape, jnp.float32) * s
    return {
        "wq": n(ks[0], (d_model, d_model), sd),
        "bq": n(ks[1], (1, d_model), 0.02),
        "wk": n(ks[2], (d_model, d_model), sd),
        "bk": n(ks[3], (1, d_model), 0.02),
        "wv": n(ks[4], (d_model, d_model), sd),
        "bv": n(ks[5], (1, d_model), 0.02),
        "wo": n(ks[6], (d_model, d_model), sd),
        "bo": n(ks[7], (1, d_model), 0.02),
        "w1": n(ks[8], (d_model, dim_ff), sd),
        "b1": n(ks[9], (1, dim_ff), 0.02),
        "w2": n(ks[10], (dim_ff, d_model), sf),
        "b2": n(ks[11], (1, d_model), 0.02),
        "g1": 1.0 + n(ks[12], (1, d_model), 0.05),
        "be1": n(ks[13], (1, d_model), 0.05),
        "g2": 1.0 + n(ks[14], (1, d_model), 0.05),
        "be2": n(ks[15], (1, d_model), 0.05),
    }


if __name__ == "__main__":
    key = jax.random.PRNGKey(0)
    k_src, k_par = jax.random.split(key)

    # Small shapes: seq=8, batch=2, d_model=32, heads=4, ffn=64, layers=2.
    S, B, D, H, FF, L = 8, 2, 32, 4, 64, 2
    src = jax.random.normal(k_src, (S, B, D), dtype=jnp.float32)
    layer_params = init_layer_params(k_par, D, FF)

    module = TransformerEncoder(layer_params, num_layers=L, num_heads=H)
    out, attn_w = module(src)
    out = jax.block_until_ready(out)
    attn_w = jax.block_until_ready(attn_w)

    # Correctness check against a pure-JAX reference.  Tolerance slightly looser
    # than before because the softmax uses the EUP approx reciprocal (+1 Newton
    # step) instead of an exact divide.
    ref_out, ref_attn = _ref_encoder(src, module.layers, H)
    assert out.shape == (S, B, D), out.shape
    assert attn_w.shape == (B, S, S), attn_w.shape
    assert np.allclose(np.asarray(out), np.asarray(ref_out), rtol=1e-3, atol=1e-3)
    assert np.allclose(np.asarray(attn_w), np.asarray(ref_attn), rtol=1e-3, atol=1e-3)
    # Attention rows must sum to (approximately) 1.
    assert np.allclose(np.asarray(attn_w).sum(-1), 1.0, atol=1e-3)

    print("KERNEL_OK")
</pallas_src>

<mosaic_0001>
module attributes {stable_mosaic.version = 11 : i64} {
  func.func @_encoder_stack_kernel(%arg0: i32, %arg1: i32, %arg2: memref<1x8x32xf32, #tpu.memory_space<vmem>>, %arg3: memref<1x32x32xf32, #tpu.memory_space<vmem>>, %arg4: memref<1x1x32xf32, #tpu.memory_space<vmem>>, %arg5: memref<1x32x32xf32, #tpu.memory_space<vmem>>, %arg6: memref<1x1x32xf32, #tpu.memory_space<vmem>>, %arg7: memref<1x32x32xf32, #tpu.memory_space<vmem>>, %arg8: memref<1x1x32xf32, #tpu.memory_space<vmem>>, %arg9: memref<1x32x32xf32, #tpu.memory_space<vmem>>, %arg10: memref<1x1x32xf32, #tpu.memory_space<vmem>>, %arg11: memref<1x32x64xf32, #tpu.memory_space<vmem>>, %arg12: memref<1x1x64xf32, #tpu.memory_space<vmem>>, %arg13: memref<1x64x32xf32, #tpu.memory_space<vmem>>, %arg14: memref<1x1x32xf32, #tpu.memory_space<vmem>>, %arg15: memref<1x1x32xf32, #tpu.memory_space<vmem>>, %arg16: memref<1x1x32xf32, #tpu.memory_space<vmem>>, %arg17: memref<1x1x32xf32, #tpu.memory_space<vmem>>, %arg18: memref<1x1x32xf32, #tpu.memory_space<vmem>>, %arg19: memref<1x8x32xf32, #tpu.memory_space<vmem>>, %arg20: memref<1x8x8xf32, #tpu.memory_space<vmem>>) attributes {dimension_semantics = [#tpu.dimension_semantics<parallel>, #tpu.dimension_semantics<arbitrary>], iteration_bounds = array<i64: 2, 2>, scalar_prefetch = 0 : i64, scratch_operands = 0 : i64, tpu.core_type = #tpu.core_type<tc>, window_params = [{transform_indices = @transform_0, window_bounds = array<i64: 1, 8, 32>}, {transform_indices = @transform_1, window_bounds = array<i64: 1, 32, 32>}, {transform_indices = @transform_2, window_bounds = array<i64: 1, 1, 32>}, {transform_indices = @transform_3, window_bounds = array<i64: 1, 32, 32>}, {transform_indices = @transform_4, window_bounds = array<i64: 1, 1, 32>}, {transform_indices = @transform_5, window_bounds = array<i64: 1, 32, 32>}, {transform_indices = @transform_6, window_bounds = array<i64: 1, 1, 32>}, {transform_indices = @transform_7, window_bounds = array<i64: 1, 32, 32>}, {transform_indices = @transform_8, window_bounds = array<i64: 1, 1, 32>}, {transform_indices = @transform_9, window_bounds = array<i64: 1, 32, 64>}, {transform_indices = @transform_10, window_bounds = array<i64: 1, 1, 64>}, {transform_indices = @transform_11, window_bounds = array<i64: 1, 64, 32>}, {transform_indices = @transform_12, window_bounds = array<i64: 1, 1, 32>}, {transform_indices = @transform_13, window_bounds = array<i64: 1, 1, 32>}, {transform_indices = @transform_14, window_bounds = array<i64: 1, 1, 32>}, {transform_indices = @transform_15, window_bounds = array<i64: 1, 1, 32>}, {transform_indices = @transform_16, window_bounds = array<i64: 1, 1, 32>}, {transform_indices = @transform_17, window_bounds = array<i64: 1, 8, 32>}, {transform_indices = @transform_18, window_bounds = array<i64: 1, 8, 8>}]} {
    %c0_i32 = arith.constant 0 : i32
    %0 = arith.cmpi eq, %arg1, %c0_i32 : i32
    %1 = arith.extui %0 : i1 to i32
    %c0_i32_0 = arith.constant 0 : i32
    %2 = arith.cmpi ne, %1, %c0_i32_0 : i32
    scf.if %2 {
      %c0_100 = arith.constant 0 : index
      %c0_101 = arith.constant 0 : index
      %c0_102 = arith.constant 0 : index
      %221 = vector.load %arg2[%c0_100, %c0_101, %c0_102] : memref<1x8x32xf32, #tpu.memory_space<vmem>>, vector<1x8x32xf32>
      %c0_103 = arith.constant 0 : index
      %c0_104 = arith.constant 0 : index
      %c0_105 = arith.constant 0 : index
      %222 = vector.load %arg19[%c0_103, %c0_104, %c0_105] : memref<1x8x32xf32, #tpu.memory_space<vmem>>, vector<1x8x32xf32>
      tpu.vector_store %arg19[%c0_103, %c0_104, %c0_105], %221 {strides = array<i32>} : memref<1x8x32xf32, #tpu.memory_space<vmem>>, vector<1x8x32xf32>,
    } else {
    }
    %c0 = arith.constant 0 : index
    %c0_1 = arith.constant 0 : index
    %c0_2 = arith.constant 0 : index
    %3 = vector.load %arg19[%c0, %c0_1, %c0_2] : memref<1x8x32xf32, #tpu.memory_space<vmem>>, vector<1x8x32xf32>
    %4 = vector.shape_cast %3 : vector<1x8x32xf32> to vector<8x32xf32>
    %c0_3 = arith.constant 0 : index
    %c0_4 = arith.constant 0 : index
    %c0_5 = arith.constant 0 : index
    %5 = vector.load %arg3[%c0_3, %c0_4, %c0_5] : memref<1x32x32xf32, #tpu.memory_space<vmem>>, vector<1x32x32xf32>
    %6 = vector.shape_cast %5 : vector<1x32x32xf32> to vector<32x32xf32>
    %c0_6 = arith.constant 0 : index
    %c0_7 = arith.constant 0 : index
    %c0_8 = arith.constant 0 : index
    %7 = vector.load %arg5[%c0_6, %c0_7, %c0_8] : memref<1x32x32xf32, #tpu.memory_space<vmem>>, vector<1x32x32xf32>
    %8 = vector.shape_cast %7 : vector<1x32x32xf32> to vector<32x32xf32>
    %c0_9 = arith.constant 0 : index
    %c0_10 = arith.constant 0 : index
    %c0_11 = arith.constant 0 : index
    %9 = vector.load %arg7[%c0_9, %c0_10, %c0_11] : memref<1x32x32xf32, #tpu.memory_space<vmem>>, vector<1x32x32xf32>
    %10 = vector.shape_cast %9 : vector<1x32x32xf32> to vector<32x32xf32>
    %c0_12 = arith.constant 0 : index
    %c0_13 = arith.constant 0 : index
    %c0_14 = arith.constant 0 : index
    %11 = vector.load %arg9[%c0_12, %c0_13, %c0_14] : memref<1x32x32xf32, #tpu.memory_space<vmem>>, vector<1x32x32xf32>
    %12 = vector.shape_cast %11 : vector<1x32x32xf32> to vector<32x32xf32>
    %cst = arith.constant dense<0.000000e+00> : vector<8x32xf32>
    %13 = tpu.matmul %4, %6, %cst {dimension_numbers = #tpu.dot_dimension_numbers<[1], [0], [0], [1], [0, 0, 1, 1], [], []>} : vector<8x32xf32>, vector<32x32xf32>, vector<8x32xf32> -> vector<8x32xf32>
    %c0_15 = arith.constant 0 : index
    %c0_16 = arith.constant 0 : index
    %c0_17 = arith.constant 0 : index
    %14 = vector.load %arg4[%c0_15, %c0_16, %c0_17] : memref<1x1x32xf32, #tpu.memory_space<vmem>>, vector<1x1x32xf32>
    %15 = vector.shape_cast %14 : vector<1x1x32xf32> to vector<1x32xf32>
    %16 = vector.broadcast %15 : vector<1x32xf32> to vector<8x32xf32>
    %17 = arith.addf %13, %16 : vector<8x32xf32>
    %cst_18 = arith.constant dense<0.000000e+00> : vector<8x32xf32>
    %18 = tpu.matmul %4, %8, %cst_18 {dimension_numbers = #tpu.dot_dimension_numbers<[1], [0], [0], [1], [0, 0, 1, 1], [], []>} : vector<8x32xf32>, vector<32x32xf32>, vector<8x32xf32> -> vector<8x32xf32>
    %c0_19 = arith.constant 0 : index
    %c0_20 = arith.constant 0 : index
    %c0_21 = arith.constant 0 : index
    %19 = vector.load %arg6[%c0_19, %c0_20, %c0_21] : memref<1x1x32xf32, #tpu.memory_space<vmem>>, vector<1x1x32xf32>
    %20 = vector.shape_cast %19 : vector<1x1x32xf32> to vector<1x32xf32>
    %21 = vector.broadcast %20 : vector<1x32xf32> to vector<8x32xf32>
    %22 = arith.addf %18, %21 : vector<8x32xf32>
    %cst_22 = arith.constant dense<0.000000e+00> : vector<8x32xf32>
    %23 = tpu.matmul %4, %10, %cst_22 {dimension_numbers = #tpu.dot_dimension_numbers<[1], [0], [0], [1], [0, 0, 1, 1], [], []>} : vector<8x32xf32>, vector<32x32xf32>, vector<8x32xf32> -> vector<8x32xf32>
    %c0_23 = arith.constant 0 : index
    %c0_24 = arith.constant 0 : index
    %c0_25 = arith.constant 0 : index
    %24 = vector.load %arg8[%c0_23, %c0_24, %c0_25] : memref<1x1x32xf32, #tpu.memory_space<vmem>>, vector<1x1x32xf32>
    %25 = vector.shape_cast %24 : vector<1x1x32xf32> to vector<1x32xf32>
    %26 = vector.broadcast %25 : vector<1x32xf32> to vector<8x32xf32>
    %27 = arith.addf %23, %26 : vector<8x32xf32>
    %cst_26 = arith.constant 0.000000e+00 : f32
    %28 = vector.broadcast %cst_26 : f32 to vector<8x32xf32>
    %cst_27 = arith.constant 0.000000e+00 : f32
    %29 = vector.broadcast %cst_27 : f32 to vector<1x8x8xf32>
    %30 = vector.extract_strided_slice %17 {offsets = [0, 0], sizes = [8, 8], strides = [1, 1]} : vector<8x32xf32> to vector<8x8xf32>
    %cst_28 = arith.constant 0.353553385 : f32
    %31 = vector.broadcast %cst_28 : f32 to vector<8x8xf32>
    %32 = arith.mulf %30, %31 : vector<8x8xf32>
    %33 = vector.shape_cast %32 : vector<8x8xf32> to vector<1x8x8xf32>
    %34 = vector.extract_strided_slice %22 {offsets = [0, 0], sizes = [8, 8], strides = [1, 1]} : vector<8x32xf32> to vector<8x8xf32>
    %35 = vector.shape_cast %34 : vector<8x8xf32> to vector<1x8x8xf32>
    %36 = vector.extract_strided_slice %27 {offsets = [0, 0], sizes = [8, 8], strides = [1, 1]} : vector<8x32xf32> to vector<8x8xf32>
    %37 = vector.shape_cast %36 : vector<8x8xf32> to vector<1x8x8xf32>
    "tpu.trace_start"() <{level = 10 : i32, message = "bqd,bkd->bqk"}> : () -> ()
    %cst_29 = arith.constant dense<0.000000e+00> : vector<1x8x8xf32>
    %38 = tpu.matmul %33, %35, %cst_29 {dimension_numbers = #tpu.dot_dimension_numbers<[2], [2], [1], [1], [0, 0, 0, 1, 1, 1], [0], [0]>} : vector<1x8x8xf32>, vector<1x8x8xf32>, vector<1x8x8xf32> -> vector<1x8x8xf32>
    "tpu.trace_stop"() : () -> ()
    %cst_30 = arith.constant dense<0xFF800000> : vector<1x8xf32>
    %39 = vector.multi_reduction <maximumf>, %38, %cst_30 [2] : vector<1x8x8xf32> to vector<1x8xf32>
    %40 = vector.shape_cast %39 : vector<1x8xf32> to vector<1x8x1xf32>
    %41 = vector.broadcast %40 : vector<1x8x1xf32> to vector<1x8x8xf32>
    %42 = arith.subf %38, %41 : vector<1x8x8xf32>
    %43 = math.exp %42 : vector<1x8x8xf32>
    %cst_31 = arith.constant dense<0.000000e+00> : vector<1x8xf32>
    %44 = vector.multi_reduction <add>, %43, %cst_31 [2] : vector<1x8x8xf32> to vector<1x8xf32>
    %45 = vector.shape_cast %44 : vector<1x8xf32> to vector<1x8x1xf32>
    %46 = tpu.reciprocal %45 {approx = true} : vector<1x8x1xf32> -> vector<1x8x1xf32>
    %47 = arith.mulf %45, %46 : vector<1x8x1xf32>
    %cst_32 = arith.constant 2.000000e+00 : f32
    %48 = vector.broadcast %cst_32 : f32 to vector<1x8x1xf32>
    %49 = arith.subf %48, %47 : vector<1x8x1xf32>
    %50 = arith.mulf %46, %49 : vector<1x8x1xf32>
    %51 = vector.broadcast %50 : vector<1x8x1xf32> to vector<1x8x8xf32>
    %52 = arith.mulf %43, %51 : vector<1x8x8xf32>
    %53 = arith.addf %29, %52 : vector<1x8x8xf32>
    "tpu.trace_start"() <{level = 10 : i32, message = "bqk,bkd->bqd"}> : () -> ()
    %cst_33 = arith.constant dense<0.000000e+00> : vector<1x8x8xf32>
    %54 = tpu.matmul %52, %37, %cst_33 {dimension_numbers = #tpu.dot_dimension_numbers<[2], [1], [1], [2], [0, 0, 0, 1, 1, 2], [0], [0]>} : vector<1x8x8xf32>, vector<1x8x8xf32>, vector<1x8x8xf32> -> vector<1x8x8xf32>
    "tpu.trace_stop"() : () -> ()
    %55 = vector.shape_cast %54 : vector<1x8x8xf32> to vector<8x8xf32>
    %56 = vector.extract_strided_slice %12 {offsets = [0, 0], sizes = [8, 32], strides = [1, 1]} : vector<32x32xf32> to vector<8x32xf32>
    %cst_34 = arith.constant dense<0.000000e+00> : vector<8x32xf32>
    %57 = tpu.matmul %55, %56, %cst_34 {dimension_numbers = #tpu.dot_dimension_numbers<[1], [0], [0], [1], [0, 0, 1, 1], [], []>} : vector<8x8xf32>, vector<8x32xf32>, vector<8x32xf32> -> vector<8x32xf32>
    %58 = arith.addf %28, %57 : vector<8x32xf32>
    %59 = vector.extract_strided_slice %17 {offsets = [0, 8], sizes = [8, 8], strides = [1, 1]} : vector<8x32xf32> to vector<8x8xf32>
    %cst_35 = arith.constant 0.353553385 : f32
    %60 = vector.broadcast %cst_35 : f32 to vector<8x8xf32>
    %61 = arith.mulf %59, %60 : vector<8x8xf32>
    %62 = vector.shape_cast %61 : vector<8x8xf32> to vector<1x8x8xf32>
    %63 = vector.extract_strided_slice %22 {offsets = [0, 8], sizes = [8, 8], strides = [1, 1]} : vector<8x32xf32> to vector<8x8xf32>
    %64 = vector.shape_cast %63 : vector<8x8xf32> to vector<1x8x8xf32>
    %65 = vector.extract_strided_slice %27 {offsets = [0, 8], sizes = [8, 8], strides = [1, 1]} : vector<8x32xf32> to vector<8x8xf32>
    %66 = vector.shape_cast %65 : vector<8x8xf32> to vector<1x8x8xf32>
    "tpu.trace_start"() <{level = 10 : i32, message = "bqd,bkd->bqk"}> : () -> ()
    %cst_36 = arith.constant dense<0.000000e+00> : vector<1x8x8xf32>
    %67 = tpu.matmul %62, %64, %cst_36 {dimension_numbers = #tpu.dot_dimension_numbers<[2], [2], [1], [1], [0, 0, 0, 1, 1, 1], [0], [0]>} : vector<1x8x8xf32>, vector<1x8x8xf32>, vector<1x8x8xf32> -> vector<1x8x8xf32>
    "tpu.trace_stop"() : () -> ()
    %cst_37 = arith.constant dense<0xFF800000> : vector<1x8xf32>
    %68 = vector.multi_reduction <maximumf>, %67, %cst_37 [2] : vector<1x8x8xf32> to vector<1x8xf32>
    %69 = vector.shape_cast %68 : vector<1x8xf32> to vector<1x8x1xf32>
    %70 = vector.broadcast %69 : vector<1x8x1xf32> to vector<1x8x8xf32>
    %71 = arith.subf %67, %70 : vector<1x8x8xf32>
    %72 = math.exp %71 : vector<1x8x8xf32>
    %cst_38 = arith.constant dense<0.000000e+00> : vector<1x8xf32>
    %73 = vector.multi_reduction <add>, %72, %cst_38 [2] : vector<1x8x8xf32> to vector<1x8xf32>
    %74 = vector.shape_cast %73 : vector<1x8xf32> to vector<1x8x1xf32>
    %75 = tpu.reciprocal %74 {approx = true} : vector<1x8x1xf32> -> vector<1x8x1xf32>
    %76 = arith.mulf %74, %75 : vector<1x8x1xf32>
    %cst_39 = arith.constant 2.000000e+00 : f32
    %77 = vector.broadcast %cst_39 : f32 to vector<1x8x1xf32>
    %78 = arith.subf %77, %76 : vector<1x8x1xf32>
    %79 = arith.mulf %75, %78 : vector<1x8x1xf32>
    %80 = vector.broadcast %79 : vector<1x8x1xf32> to vector<1x8x8xf32>
    %81 = arith.mulf %72, %80 : vector<1x8x8xf32>
    %82 = arith.addf %53, %81 : vector<1x8x8xf32>
    "tpu.trace_start"() <{level = 10 : i32, message = "bqk,bkd->bqd"}> : () -> ()
    %cst_40 = arith.constant dense<0.000000e+00> : vector<1x8x8xf32>
    %83 = tpu.matmul %81, %66, %cst_40 {dimension_numbers = #tpu.dot_dimension_numbers<[2], [1], [1], [2], [0, 0, 0, 1, 1, 2], [0], [0]>} : vector<1x8x8xf32>, vector<1x8x8xf32>, vector<1x8x8xf32> -> vector<1x8x8xf32>
    "tpu.trace_stop"() : () -> ()
    %84 = vector.shape_cast %83 : vector<1x8x8xf32> to vector<8x8xf32>
    %85 = vector.extract_strided_slice %12 {offsets = [8, 0], sizes = [8, 32], strides = [1, 1]} : vector<32x32xf32> to vector<8x32xf32>
    %cst_41 = arith.constant dense<0.000000e+00> : vector<8x32xf32>
    %86 = tpu.matmul %84, %85, %cst_41 {dimension_numbers = #tpu.dot_dimension_numbers<[1], [0], [0], [1], [0, 0, 1, 1], [], []>} : vector<8x8xf32>, vector<8x32xf32>, vector<8x32xf32> -> vector<8x32xf32>
    %87 = arith.addf %58, %86 : vector<8x32xf32>
    %88 = vector.extract_strided_slice %17 {offsets = [0, 16], sizes = [8, 8], strides = [1, 1]} : vector<8x32xf32> to vector<8x8xf32>
    %cst_42 = arith.constant 0.353553385 : f32
    %89 = vector.broadcast %cst_42 : f32 to vector<8x8xf32>
    %90 = arith.mulf %88, %89 : vector<8x8xf32>
    %91 = vector.shape_cast %90 : vector<8x8xf32> to vector<1x8x8xf32>
    %92 = vector.extract_strided_slice %22 {offsets = [0, 16], sizes = [8, 8], strides = [1, 1]} : vector<8x32xf32> to vector<8x8xf32>
    %93 = vector.shape_cast %92 : vector<8x8xf32> to vector<1x8x8xf32>
    %94 = vector.extract_strided_slice %27 {offsets = [0, 16], sizes = [8, 8], strides = [1, 1]} : vector<8x32xf32> to vector<8x8xf32>
    %95 = vector.shape_cast %94 : vector<8x8xf32> to vector<1x8x8xf32>
    "tpu.trace_start"() <{level = 10 : i32, message = "bqd,bkd->bqk"}> : () -> ()
    %cst_43 = arith.constant dense<0.000000e+00> : vector<1x8x8xf32>
    %96 = tpu.matmul %91, %93, %cst_43 {dimension_numbers = #tpu.dot_dimension_numbers<[2], [2], [1], [1], [0, 0, 0, 1, 1, 1], [0], [0]>} : vector<1x8x8xf32>, vector<1x8x8xf32>, vector<1x8x8xf32> -> vector<1x8x8xf32>
    "tpu.trace_stop"() : () -> ()
    %cst_44 = arith.constant dense<0xFF800000> : vector<1x8xf32>
    %97 = vector.multi_reduction <maximumf>, %96, %cst_44 [2] : vector<1x8x8xf32> to vector<1x8xf32>
    %98 = vector.shape_cast %97 : vector<1x8xf32> to vector<1x8x1xf32>
    %99 = vector.broadcast %98 : vector<1x8x1xf32> to vector<1x8x8xf32>
    %100 = arith.subf %96, %99 : vector<1x8x8xf32>
    %101 = math.exp %100 : vector<1x8x8xf32>
    %cst_45 = arith.constant dense<0.000000e+00> : vector<1x8xf32>
    %102 = vector.multi_reduction <add>, %101, %cst_45 [2] : vector<1x8x8xf32> to vector<1x8xf32>
    %103 = vector.shape_cast %102 : vector<1x8xf32> to vector<1x8x1xf32>
    %104 = tpu.reciprocal %103 {approx = true} : vector<1x8x1xf32> -> vector<1x8x1xf32>
    %105 = arith.mulf %103, %104 : vector<1x8x1xf32>
    %cst_46 = arith.constant 2.000000e+00 : f32
    %106 = vector.broadcast %cst_46 : f32 to vector<1x8x1xf32>
    %107 = arith.subf %106, %105 : vector<1x8x1xf32>
    %108 = arith.mulf %104, %107 : vector<1x8x1xf32>
    %109 = vector.broadcast %108 : vector<1x8x1xf32> to vector<1x8x8xf32>
    %110 = arith.mulf %101, %109 : vector<1x8x8xf32>
    %111 = arith.addf %82, %110 : vector<1x8x8xf32>
    "tpu.trace_start"() <{level = 10 : i32, message = "bqk,bkd->bqd"}> : () -> ()
    %cst_47 = arith.constant dense<0.000000e+00> : vector<1x8x8xf32>
    %112 = tpu.matmul %110, %95, %cst_47 {dimension_numbers = #tpu.dot_dimension_numbers<[2], [1], [1], [2], [0, 0, 0, 1, 1, 2], [0], [0]>} : vector<1x8x8xf32>, vector<1x8x8xf32>, vector<1x8x8xf32> -> vector<1x8x8xf32>
    "tpu.trace_stop"() : () -> ()
    %113 = vector.shape_cast %112 : vector<1x8x8xf32> to vector<8x8xf32>
    %114 = vector.extract_strided_slice %12 {offsets = [16, 0], sizes = [8, 32], strides = [1, 1]} : vector<32x32xf32> to vector<8x32xf32>
    %cst_48 = arith.constant dense<0.000000e+00> : vector<8x32xf32>
    %115 = tpu.matmul %113, %114, %cst_48 {dimension_numbers = #tpu.dot_dimension_numbers<[1], [0], [0], [1], [0, 0, 1, 1], [], []>} : vector<8x8xf32>, vector<8x32xf32>, vector<8x32xf32> -> vector<8x32xf32>
    %116 = arith.addf %87, %115 : vector<8x32xf32>
    %117 = vector.extract_strided_slice %17 {offsets = [0, 24], sizes = [8, 8], strides = [1, 1]} : vector<8x32xf32> to vector<8x8xf32>
    %cst_49 = arith.constant 0.353553385 : f32
    %118 = vector.broadcast %cst_49 : f32 to vector<8x8xf32>
    %119 = arith.mulf %117, %118 : vector<8x8xf32>
    %120 = vector.shape_cast %119 : vector<8x8xf32> to vector<1x8x8xf32>
    %121 = vector.extract_strided_slice %22 {offsets = [0, 24], sizes = [8, 8], strides = [1, 1]} : vector<8x32xf32> to vector<8x8xf32>
    %122 = vector.shape_cast %121 : vector<8x8xf32> to vector<1x8x8xf32>
    %123 = vector.extract_strided_slice %27 {offsets = [0, 24], sizes = [8, 8], strides = [1, 1]} : vector<8x32xf32> to vector<8x8xf32>
    %124 = vector.shape_cast %123 : vector<8x8xf32> to vector<1x8x8xf32>
    "tpu.trace_start"() <{level = 10 : i32, message = "bqd,bkd->bqk"}> : () -> ()
    %cst_50 = arith.constant dense<0.000000e+00> : vector<1x8x8xf32>
    %125 = tpu.matmul %120, %122, %cst_50 {dimension_numbers = #tpu.dot_dimension_numbers<[2], [2], [1], [1], [0, 0, 0, 1, 1, 1], [0], [0]>} : vector<1x8x8xf32>, vector<1x8x8xf32>, vector<1x8x8xf32> -> vector<1x8x8xf32>
    "tpu.trace_stop"() : () -> ()
    %cst_51 = arith.constant dense<0xFF800000> : vector<1x8xf32>
    %126 = vector.multi_reduction <maximumf>, %125, %cst_51 [2] : vector<1x8x8xf32> to vector<1x8xf32>
    %127 = vector.shape_cast %126 : vector<1x8xf32> to vector<1x8x1xf32>
    %128 = vector.broadcast %127 : vector<1x8x1xf32> to vector<1x8x8xf32>
    %129 = arith.subf %125, %128 : vector<1x8x8xf32>
    %130 = math.exp %129 : vector<1x8x8xf32>
    %cst_52 = arith.constant dense<0.000000e+00> : vector<1x8xf32>
    %131 = vector.multi_reduction <add>, %130, %cst_52 [2] : vector<1x8x8xf32> to vector<1x8xf32>
    %132 = vector.shape_cast %131 : vector<1x8xf32> to vector<1x8x1xf32>
    %133 = tpu.reciprocal %132 {approx = true} : vector<1x8x1xf32> -> vector<1x8x1xf32>
    %134 = arith.mulf %132, %133 : vector<1x8x1xf32>
    %cst_53 = arith.constant 2.000000e+00 : f32
    %135 = vector.broadcast %cst_53 : f32 to vector<1x8x1xf32>
    %136 = arith.subf %135, %134 : vector<1x8x1xf32>
    %137 = arith.mulf %133, %136 : vector<1x8x1xf32>
    %138 = vector.broadcast %137 : vector<1x8x1xf32> to vector<1x8x8xf32>
    %139 = arith.mulf %130, %138 : vector<1x8x8xf32>
    %140 = arith.addf %111, %139 : vector<1x8x8xf32>
    "tpu.trace_start"() <{level = 10 : i32, message = "bqk,bkd->bqd"}> : () -> ()
    %cst_54 = arith.constant dense<0.000000e+00> : vector<1x8x8xf32>
    %141 = tpu.matmul %139, %124, %cst_54 {dimension_numbers = #tpu.dot_dimension_numbers<[2], [1], [1], [2], [0, 0, 0, 1, 1, 2], [0], [0]>} : vector<1x8x8xf32>, vector<1x8x8xf32>, vector<1x8x8xf32> -> vector<1x8x8xf32>
    "tpu.trace_stop"() : () -> ()
    %142 = vector.shape_cast %141 : vector<1x8x8xf32> to vector<8x8xf32>
    %143 = vector.extract_strided_slice %12 {offsets = [24, 0], sizes = [8, 32], strides = [1, 1]} : vector<32x32xf32> to vector<8x32xf32>
    %cst_55 = arith.constant dense<0.000000e+00> : vector<8x32xf32>
    %144 = tpu.matmul %142, %143, %cst_55 {dimension_numbers = #tpu.dot_dimension_numbers<[1], [0], [0], [1], [0, 0, 1, 1], [], []>} : vector<8x8xf32>, vector<8x32xf32>, vector<8x32xf32> -> vector<8x32xf32>
    %145 = arith.addf %116, %144 : vector<8x32xf32>
    %c0_56 = arith.constant 0 : index
    %c0_57 = arith.constant 0 : index
    %c0_58 = arith.constant 0 : index
    %146 = vector.load %arg10[%c0_56, %c0_57, %c0_58] : memref<1x1x32xf32, #tpu.memory_space<vmem>>, vector<1x1x32xf32>
    %147 = vector.shape_cast %146 : vector<1x1x32xf32> to vector<1x32xf32>
    %148 = vector.broadcast %147 : vector<1x32xf32> to vector<8x32xf32>
    %149 = arith.addf %145, %148 : vector<8x32xf32>
    %150 = arith.addf %4, %149 : vector<8x32xf32>
    %c0_59 = arith.constant 0 : index
    %c0_60 = arith.constant 0 : index
    %c0_61 = arith.constant 0 : index
    %151 = vector.load %arg15[%c0_59, %c0_60, %c0_61] : memref<1x1x32xf32, #tpu.memory_space<vmem>>, vector<1x1x32xf32>
    %152 = vector.shape_cast %151 : vector<1x1x32xf32> to vector<1x32xf32>
    %c0_62 = arith.constant 0 : index
    %c0_63 = arith.constant 0 : index
    %c0_64 = arith.constant 0 : index
    %153 = vector.load %arg16[%c0_62, %c0_63, %c0_64] : memref<1x1x32xf32, #tpu.memory_space<vmem>>, vector<1x1x32xf32>
    %154 = vector.shape_cast %153 : vector<1x1x32xf32> to vector<1x32xf32>
    %cst_65 = arith.constant dense<0.000000e+00> : vector<8xf32>
    %155 = vector.multi_reduction <add>, %150, %cst_65 [1] : vector<8x32xf32> to vector<8xf32>
    %156 = vector.shape_cast %155 : vector<8xf32> to vector<8x1xf32>
    %cst_66 = arith.constant 3.200000e+01 : f32
    %157 = vector.broadcast %cst_66 : f32 to vector<8x1xf32>
    %158 = arith.divf %156, %157 : vector<8x1xf32>
    %159 = vector.broadcast %158 : vector<8x1xf32> to vector<8x32xf32>
    %160 = arith.subf %150, %159 : vector<8x32xf32>
    %161 = arith.mulf %160, %160 : vector<8x32xf32>
    %cst_67 = arith.constant dense<0.000000e+00> : vector<8xf32>
    %162 = vector.multi_reduction <add>, %161, %cst_67 [1] : vector<8x32xf32> to vector<8xf32>
    %163 = vector.shape_cast %162 : vector<8xf32> to vector<8x1xf32>
    %cst_68 = arith.constant 3.200000e+01 : f32
    %164 = vector.broadcast %cst_68 : f32 to vector<8x1xf32>
    %165 = arith.divf %163, %164 : vector<8x1xf32>
    %cst_69 = arith.constant 9.99999974E-6 : f32
    %166 = vector.broadcast %cst_69 : f32 to vector<8x1xf32>
    %167 = arith.addf %165, %166 : vector<8x1xf32>
    %168 = math.rsqrt %167 : vector<8x1xf32>
    %169 = vector.broadcast %168 : vector<8x1xf32> to vector<8x32xf32>
    %170 = arith.mulf %160, %169 : vector<8x32xf32>
    %171 = vector.broadcast %152 : vector<1x32xf32> to vector<8x32xf32>
    %172 = arith.mulf %170, %171 : vector<8x32xf32>
    %173 = vector.broadcast %154 : vector<1x32xf32> to vector<8x32xf32>
    %174 = arith.addf %172, %173 : vector<8x32xf32>
    %c0_70 = arith.constant 0 : index
    %c0_71 = arith.constant 0 : index
    %c0_72 = arith.constant 0 : index
    %175 = vector.load %arg11[%c0_70, %c0_71, %c0_72] : memref<1x32x64xf32, #tpu.memory_space<vmem>>, vector<1x32x64xf32>
    %176 = vector.shape_cast %175 : vector<1x32x64xf32> to vector<32x64xf32>
    %cst_73 = arith.constant dense<0.000000e+00> : vector<8x64xf32>
    %177 = tpu.matmul %174, %176, %cst_73 {dimension_numbers = #tpu.dot_dimension_numbers<[1], [0], [0], [1], [0, 0, 1, 1], [], []>} : vector<8x32xf32>, vector<32x64xf32>, vector<8x64xf32> -> vector<8x64xf32>
    %c0_74 = arith.constant 0 : index
    %c0_75 = arith.constant 0 : index
    %c0_76 = arith.constant 0 : index
    %178 = vector.load %arg12[%c0_74, %c0_75, %c0_76] : memref<1x1x64xf32, #tpu.memory_space<vmem>>, vector<1x1x64xf32>
    %179 = vector.shape_cast %178 : vector<1x1x64xf32> to vector<1x64xf32>
    %180 = vector.broadcast %179 : vector<1x64xf32> to vector<8x64xf32>
    %181 = arith.addf %177, %180 : vector<8x64xf32>
    %cst_77 = arith.constant 0.000000e+00 : f32
    %182 = vector.broadcast %cst_77 : f32 to vector<8x64xf32>
    %183 = arith.maximumf %181, %182 : vector<8x64xf32>
    %c0_78 = arith.constant 0 : index
    %c0_79 = arith.constant 0 : index
    %c0_80 = arith.constant 0 : index
    %184 = vector.load %arg13[%c0_78, %c0_79, %c0_80] : memref<1x64x32xf32, #tpu.memory_space<vmem>>, vector<1x64x32xf32>
    %185 = vector.shape_cast %184 : vector<1x64x32xf32> to vector<64x32xf32>
    %cst_81 = arith.constant dense<0.000000e+00> : vector<8x32xf32>
    %186 = tpu.matmul %183, %185, %cst_81 {dimension_numbers = #tpu.dot_dimension_numbers<[1], [0], [0], [1], [0, 0, 1, 1], [], []>} : vector<8x64xf32>, vector<64x32xf32>, vector<8x32xf32> -> vector<8x32xf32>
    %c0_82 = arith.constant 0 : index
    %c0_83 = arith.constant 0 : index
    %c0_84 = arith.constant 0 : index
    %187 = vector.load %arg14[%c0_82, %c0_83, %c0_84] : memref<1x1x32xf32, #tpu.memory_space<vmem>>, vector<1x1x32xf32>
    %188 = vector.shape_cast %187 : vector<1x1x32xf32> to vector<1x32xf32>
    %189 = vector.broadcast %188 : vector<1x32xf32> to vector<8x32xf32>
    %190 = arith.addf %186, %189 : vector<8x32xf32>
    %191 = arith.addf %174, %190 : vector<8x32xf32>
    %c0_85 = arith.constant 0 : index
    %c0_86 = arith.constant 0 : index
    %c0_87 = arith.constant 0 : index
    %192 = vector.load %arg17[%c0_85, %c0_86, %c0_87] : memref<1x1x32xf32, #tpu.memory_space<vmem>>, vector<1x1x32xf32>
    %193 = vector.shape_cast %192 : vector<1x1x32xf32> to vector<1x32xf32>
    %c0_88 = arith.constant 0 : index
    %c0_89 = arith.constant 0 : index
    %c0_90 = arith.constant 0 : index
    %194 = vector.load %arg18[%c0_88, %c0_89, %c0_90] : memref<1x1x32xf32, #tpu.memory_space<vmem>>, vector<1x1x32xf32>
    %195 = vector.shape_cast %194 : vector<1x1x32xf32> to vector<1x32xf32>
    %cst_91 = arith.constant dense<0.000000e+00> : vector<8xf32>
    %196 = vector.multi_reduction <add>, %191, %cst_91 [1] : vector<8x32xf32> to vector<8xf32>
    %197 = vector.shape_cast %196 : vector<8xf32> to vector<8x1xf32>
    %cst_92 = arith.constant 3.200000e+01 : f32
    %198 = vector.broadcast %cst_92 : f32 to vector<8x1xf32>
    %199 = arith.divf %197, %198 : vector<8x1xf32>
    %200 = vector.broadcast %199 : vector<8x1xf32> to vector<8x32xf32>
    %201 = arith.subf %191, %200 : vector<8x32xf32>
    %202 = arith.mulf %201, %201 : vector<8x32xf32>
    %cst_93 = arith.constant dense<0.000000e+00> : vector<8xf32>
    %203 = vector.multi_reduction <add>, %202, %cst_93 [1] : vector<8x32xf32> to vector<8xf32>
    %204 = vector.shape_cast %203 : vector<8xf32> to vector<8x1xf32>
    %cst_94 = arith.constant 3.200000e+01 : f32
    %205 = vector.broadcast %cst_94 : f32 to vector<8x1xf32>
    %206 = arith.divf %204, %205 : vector<8x1xf32>
    %cst_95 = arith.constant 9.99999974E-6 : f32
    %207 = vector.broadcast %cst_95 : f32 to vector<8x1xf32>
    %208 = arith.addf %206, %207 : vector<8x1xf32>
    %209 = math.rsqrt %208 : vector<8x1xf32>
    %210 = vector.broadcast %209 : vector<8x1xf32> to vector<8x32xf32>
    %211 = arith.mulf %201, %210 : vector<8x32xf32>
    %212 = vector.broadcast %193 : vector<1x32xf32> to vector<8x32xf32>
    %213 = arith.mulf %211, %212 : vector<8x32xf32>
    %214 = vector.broadcast %195 : vector<1x32xf32> to vector<8x32xf32>
    %215 = arith.addf %213, %214 : vector<8x32xf32>
    %216 = vector.shape_cast %215 : vector<8x32xf32> to vector<1x8x32xf32>
    %c0_96 = arith.constant 0 : index
    %c0_97 = arith.constant 0 : index
    %c0_98 = arith.constant 0 : index
    %217 = vector.load %arg19[%c0_96, %c0_97, %c0_98] : memref<1x8x32xf32, #tpu.memory_space<vmem>>, vector<1x8x32xf32>
    tpu.vector_store %arg19[%c0_96, %c0_97, %c0_98], %216 {strides = array<i32>} : memref<1x8x32xf32, #tpu.memory_space<vmem>>, vector<1x8x32xf32>,
    %c1_i32 = arith.constant 1 : i32
    %218 = arith.cmpi eq, %arg1, %c1_i32 : i32
    %219 = arith.extui %218 : i1 to i32
    %c0_i32_99 = arith.constant 0 : i32
    %220 = arith.cmpi ne, %219, %c0_i32_99 : i32
    scf.if %220 {
      %cst_100 = arith.constant 2.500000e-01 : f32
      %221 = vector.broadcast %cst_100 : f32 to vector<1x8x8xf32>
      %222 = arith.mulf %140, %221 : vector<1x8x8xf32>
      %c0_101 = arith.constant 0 : index
      %c0_102 = arith.constant 0 : index
      %c0_103 = arith.constant 0 : index
      %223 = vector.load %arg20[%c0_101, %c0_102, %c0_103] : memref<1x8x8xf32, #tpu.memory_space<vmem>>, vector<1x8x8xf32>
      tpu.vector_store %arg20[%c0_101, %c0_102, %c0_103], %222 {strides = array<i32>} : memref<1x8x8xf32, #tpu.memory_space<vmem>>, vector<1x8x8xf32>,
    } else {
    }
    return
  }
  func.func @transform_0(%arg0: i32, %arg1: i32) -> (i32, i32, i32) {
    %c0_i32 = arith.constant 0 : i32
    %c0_i32_0 = arith.constant 0 : i32
    %c0_i32_1 = arith.constant 0 : i32
    return %arg0, %c0_i32, %c0_i32_0 : i32, i32, i32
  }
  func.func @transform_1(%arg0: i32, %arg1: i32) -> (i32, i32, i32) {
    %c0_i32 = arith.constant 0 : i32
    %c0_i32_0 = arith.constant 0 : i32
    %c0_i32_1 = arith.constant 0 : i32
    return %arg1, %c0_i32, %c0_i32_0 : i32, i32, i32
  }
  func.func @transform_2(%arg0: i32, %arg1: i32) -> (i32, i32, i32) {
    %c0_i32 = arith.constant 0 : i32
    %c0_i32_0 = arith.constant 0 : i32
    %c0_i32_1 = arith.constant 0 : i32
    return %arg1, %c0_i32, %c0_i32_0 : i32, i32, i32
  }
  func.func @transform_3(%arg0: i32, %arg1: i32) -> (i32, i32, i32) {
    %c0_i32 = arith.constant 0 : i32
    %c0_i32_0 = arith.constant 0 : i32
    %c0_i32_1 = arith.constant 0 : i32
    return %arg1, %c0_i32, %c0_i32_0 : i32, i32, i32
  }
  func.func @transform_4(%arg0: i32, %arg1: i32) -> (i32, i32, i32) {
    %c0_i32 = arith.constant 0 : i32
    %c0_i32_0 = arith.constant 0 : i32
    %c0_i32_1 = arith.constant 0 : i32
    return %arg1, %c0_i32, %c0_i32_0 : i32, i32, i32
  }
  func.func @transform_5(%arg0: i32, %arg1: i32) -> (i32, i32, i32) {
    %c0_i32 = arith.constant 0 : i32
    %c0_i32_0 = arith.constant 0 : i32
    %c0_i32_1 = arith.constant 0 : i32
    return %arg1, %c0_i32, %c0_i32_0 : i32, i32, i32
  }
  func.func @transform_6(%arg0: i32, %arg1: i32) -> (i32, i32, i32) {
    %c0_i32 = arith.constant 0 : i32
    %c0_i32_0 = arith.constant 0 : i32
    %c0_i32_1 = arith.constant 0 : i32
    return %arg1, %c0_i32, %c0_i32_0 : i32, i32, i32
  }
  func.func @transform_7(%arg0: i32, %arg1: i32) -> (i32, i32, i32) {
    %c0_i32 = arith.constant 0 : i32
    %c0_i32_0 = arith.constant 0 : i32
    %c0_i32_1 = arith.constant 0 : i32
    return %arg1, %c0_i32, %c0_i32_0 : i32, i32, i32
  }
  func.func @transform_8(%arg0: i32, %arg1: i32) -> (i32, i32, i32) {
    %c0_i32 = arith.constant 0 : i32
    %c0_i32_0 = arith.constant 0 : i32
    %c0_i32_1 = arith.constant 0 : i32
    return %arg1, %c0_i32, %c0_i32_0 : i32, i32, i32
  }
  func.func @transform_9(%arg0: i32, %arg1: i32) -> (i32, i32, i32) {
    %c0_i32 = arith.constant 0 : i32
    %c0_i32_0 = arith.constant 0 : i32
    %c0_i32_1 = arith.constant 0 : i32
    return %arg1, %c0_i32, %c0_i32_0 : i32, i32, i32
  }
  func.func @transform_10(%arg0: i32, %arg1: i32) -> (i32, i32, i32) {
    %c0_i32 = arith.constant 0 : i32
    %c0_i32_0 = arith.constant 0 : i32
    %c0_i32_1 = arith.constant 0 : i32
    return %arg1, %c0_i32, %c0_i32_0 : i32, i32, i32
  }
  func.func @transform_11(%arg0: i32, %arg1: i32) -> (i32, i32, i32) {
    %c0_i32 = arith.constant 0 : i32
    %c0_i32_0 = arith.constant 0 : i32
    %c0_i32_1 = arith.constant 0 : i32
    return %arg1, %c0_i32, %c0_i32_0 : i32, i32, i32
  }
  func.func @transform_12(%arg0: i32, %arg1: i32) -> (i32, i32, i32) {
    %c0_i32 = arith.constant 0 : i32
    %c0_i32_0 = arith.constant 0 : i32
    %c0_i32_1 = arith.constant 0 : i32
    return %arg1, %c0_i32, %c0_i32_0 : i32, i32, i32
  }
  func.func @transform_13(%arg0: i32, %arg1: i32) -> (i32, i32, i32) {
    %c0_i32 = arith.constant 0 : i32
    %c0_i32_0 = arith.constant 0 : i32
    %c0_i32_1 = arith.constant 0 : i32
    return %arg1, %c0_i32, %c0_i32_0 : i32, i32, i32
  }
  func.func @transform_14(%arg0: i32, %arg1: i32) -> (i32, i32, i32) {
    %c0_i32 = arith.constant 0 : i32
    %c0_i32_0 = arith.constant 0 : i32
    %c0_i32_1 = arith.constant 0 : i32
    return %arg1, %c0_i32, %c0_i32_0 : i32, i32, i32
  }
  func.func @transform_15(%arg0: i32, %arg1: i32) -> (i32, i32, i32) {
    %c0_i32 = arith.constant 0 : i32
    %c0_i32_0 = arith.constant 0 : i32
    %c0_i32_1 = arith.constant 0 : i32
    return %arg1, %c0_i32, %c0_i32_0 : i32, i32, i32
  }
  func.func @transform_16(%arg0: i32, %arg1: i32) -> (i32, i32, i32) {
    %c0_i32 = arith.constant 0 : i32
    %c0_i32_0 = arith.constant 0 : i32
    %c0_i32_1 = arith.constant 0 : i32
    return %arg1, %c0_i32, %c0_i32_0 : i32, i32, i32
  }
  func.func @transform_17(%arg0: i32, %arg1: i32) -> (i32, i32, i32) {
    %c0_i32 = arith.constant 0 : i32
    %c0_i32_0 = arith.constant 0 : i32
    %c0_i32_1 = arith.constant 0 : i32
    return %arg0, %c0_i32, %c0_i32_0 : i32, i32, i32
  }
  func.func @transform_18(%arg0: i32, %arg1: i32) -> (i32, i32, i32) {
    %c0_i32 = arith.constant 0 : i32
    %c0_i32_0 = arith.constant 0 : i32
    %c0_i32_1 = arith.constant 0 : i32
    return %arg0, %c0_i32, %c0_i32_0 : i32, i32, i32
  }
}

</mosaic_0001>

<bundles_post_ra>
// kernel: tpu_custom_call.1
= control target key start
LH: loop header
LB: loop body
LE: loop exit
PB: predicated region body
PF: predicated region fallthrough
CT: control target
= control target key end

     0   :  { %s4172_s0 = inlined_call_operand.hbm [shape: f32[2,8,32], index: 0, kind: input, shape index: {}]   ;;  %s4173_s1 = inlined_call_operand.vmem [shape: f32[2,32,32], index: 1, kind: input, shape index: {}]   ;;  %s4174_s2 = inlined_call_operand.vmem [shape: f32[2,1,32], index: 2, kind: input, shape index: {}]   ;;  %s4175_s3 = inlined_call_operand.vmem [shape: f32[2,32,32], index: 3, kind: input, shape index: {}]   ;;  %s4176_s4 = inlined_call_operand.vmem [shape: f32[2,1,32], index: 4, kind: input, shape index: {}]   ;;  %s4177_s5 = inlined_call_operand.vmem [shape: f32[2,32,32], index: 5, kind: input, shape index: {}]   ;;  %s4178_s6 = inlined_call_operand.vmem [shape: f32[2,1,32], index: 6, kind: input, shape index: {}]   ;;  %s4179_s7 = inlined_call_operand.hbm [shape: f32[2,32,32], index: 7, kind: input, shape index: {}]   ;;  %s4180_s8 = inlined_call_operand.vmem [shape: f32[2,1,32], index: 8, kind: input, shape index: {}]   ;;  %s4181_s9 = inlined_call_operand.hbm [shape: f32[2,32,64], index: 9, kind: input, shape index: {}]   ;;  %s4182_s10 = inlined_call_operand.vmem [shape: f32[2,1,64], index: 10, kind: input, shape index: {}]   ;;  %s4183_s11 = inlined_call_operand.vmem [shape: f32[2,64,32], index: 11, kind: input, shape index: {}]   ;;  %s4184_s12 = inlined_call_operand.vmem [shape: f32[2,1,32], index: 12, kind: input, shape index: {}]   ;;  %s4185_s13 = inlined_call_operand.vmem [shape: f32[2,1,32], index: 13, kind: input, shape index: {}]   ;;  %s4186_s14 = inlined_call_operand.vmem [shape: f32[2,1,32], index: 14, kind: input, shape index: {}]   ;;  %s4187_s15 = inlined_call_operand.vmem [shape: f32[2,1,32], index: 15, kind: input, shape index: {}]   ;;  %s4188_s16 = inlined_call_operand.vmem [shape: f32[2,1,32], index: 16, kind: input, shape index: {}]   ;;  %s4189_s17 = inlined_call_operand.hbm [shape: f32[2,8,32], index: 17, kind: output, shape index: {0}]   ;;  %s4190_s18 = inlined_call_operand.hbm [shape: f32[2,8,8], index: 18, kind: output, shape index: {1}]  }
   0x1   :  { %4219 = sst [smem:[#allocation30_spill]] %s4172_s0 }
   0x2   :  { %4220 = sst [smem:[#allocation31_spill]] %s4173_s1 }
   0x3   :  { %4221 = sst [smem:[#allocation32_spill]] %s4174_s2 }
   0x4   :  { %4222 = sst [smem:[#allocation33_spill]] %s4175_s3 }
   0x5   :  { %4223 = sst [smem:[#allocation34_spill]] %s4176_s4 }
   0x6   :  { %4224 = sst [smem:[#allocation35_spill]] %s4177_s5 }
   0x7   :  { %4225 = sst [smem:[#allocation36_spill]] %s4178_s6 }
   0x8   :  { %4226 = sst [smem:[#allocation37_spill]] %s4179_s7 }
   0x9   :  { %4227 = sst [smem:[#allocation38_spill]] %s4180_s8 }
   0xa   :  { %4228 = sst [smem:[#allocation39_spill]] %s4181_s9 }
   0xb   :  { %4229 = sst [smem:[#allocation40_spill]] %s4182_s10 }
   0xc   :  { %4230 = sst [smem:[#allocation41_spill]] %s4183_s11 }
   0xd   :  { %4231 = sst [smem:[#allocation42_spill]] %s4184_s12 }
   0xe   :  { %4232 = sst [smem:[#allocation43_spill]] %s4185_s13 }
   0xf   :  { %4233 = sst [smem:[#allocation44_spill]] %s4186_s14 }
  0x10   :  { %4234 = sst [smem:[#allocation45_spill]] %s4187_s15 }
  0x11   :  { %4235 = sst [smem:[#allocation46_spill]] %s4188_s16 }
  0x12   :  { %4236 = sst [smem:[#allocation47_spill]] %s4189_s17 }
  0x13   :  { %4237 = sst [smem:[#allocation48_spill]] %s4190_s18 }
  0x14   :  { %24 = vsyncpa [#allocation3], 0 }
  0x15   :  { %26 = vsyncpa [#allocation3 + $0x1], 0 }
  0x16   :  { %27 = vsyncpa [#allocation6], 0 }
  0x17   :  { %29 = vsyncpa [#allocation6 + $0x1], 0 }
  0x18   :  { %30 = vsyncpa [#allocation4], 0 }
  0x19   :  { %32 = vsyncpa [#allocation4 + $0x1], 0 }
  0x1a   :  { %33 = vsyncpa [#allocation10], 0 }
  0x1b   :  { %35 = vsyncpa [#allocation10 + $0x1], 0  ;;  %s3500_s27 = smov 0   ;;  %s3502_s28 = smov 0  }
  0x1c   :  { %s3504_s29 = smov 0   ;;  %s3506_s30 = smov 0  }
  0x1d   :  { %s3508_s0 = smov 0   ;;  %s3510_s19 = smov 0  }
  0x1e   :  { %s3512_s1 = smov 0   ;;  %s3514_s20 = smov 0  }
  0x1f   :  { %s3516_s21 = smov 0   ;;  %s3518_s22 = smov 0  }
  0x20   :  { %s3520_s2 = smov 0  }
  0x21 LB: > { %4238 = sst [smem:[#allocation15_spill]] %s3354_s28  ;;  %s50_s23 = sadd.s32 1, %s3382_s21  ;;  %s3390_s2 = sphi %s3520_s2, %s41_s2   ;;  %s3386_s22 = sphi %s3518_s22, %s4324_s22   ;;  %s3382_s21 = sphi %s3516_s21, %s4323_s21   ;;  %s3378_s20 = sphi %s3514_s20, %s4322_s20   ;;  %s3374_s1 = sphi %s3512_s1, %s4321_s1   ;;  %s3370_s19 = sphi %s3510_s19, %s4320_s19   ;;  %s3366_s0 = sphi %s3508_s0, %s4319_s0   ;;  %s3362_s30 = sphi %s3506_s30, %s4318_s30   ;;  %s3358_s29 = sphi %s3504_s29, %s4317_s29   ;;  %s3354_s28 = sphi %s3502_s28, %s4316_s28   ;;  %s3350_s27 = sphi %s3500_s27, %s4315_s27  }
  0x22   : > { %4239 = sst [smem:[#allocation16_spill]] %s3358_s29  ;;  %p4199_p0 = scmp.eq.s32.totalorder %s3390_s2, 0 }
  0x23   : > { %4240 = sst [smem:[#allocation17_spill]] %s3362_s30  ;;  %p3557_p1 = scmp.ge.s32.totalorder %s50_s23, 2 }
  0x24   : > { %4241 = sst [smem:[#allocation18_spill]] %s3366_s0  ;;  %s242_s25 = sadd.s32 1, %s3358_s29 }
  0x25   : > { %4242 = sst [smem:[#allocation19_spill]] %s3370_s19  ;;  %p249_p2 = scmp.ne.s32.totalorder %s3358_s29, %s3354_s28 }
  0x26   : > { %4243 = sst [smem:[#allocation20_spill]] %s3378_s20  ;;  %s4326_s23 = smov (%p3557_p1, %s50_s23), 0 }
  0x27   : > { %4244 = sst [smem:[#allocation21_spill]] %s3382_s21  ;;  %p251_p3 = por %p249_p2, %p4199_p0 }
  0x28   : > { %4245 = sst [smem:[#allocation22_spill]] %s3386_s22  ;;  %s239_s26 = ssub.s32 %s3382_s21, %s4326_s23 }
  0x29   : > { %4246 = sst [smem:[#allocation23_spill]] %s3390_s2  ;;  %p4198_p4 = scmp.lt.s32.totalorder %s3390_s2, 4 }
  0x2a   : > { %4248 = sst [smem:[#allocation24_spill]] %s4326_s23  ;;  %p240_p5 = scmp.eq.s32.totalorder %s239_s26, 0 }
  0x2b   : > { %s625_s18 = sand.u32 1, %s3390_s2   ;;  %s627_s17 = sand.u32 1, %s3358_s29  }
  0x2c   : > { %s3576_s20 = scalar_select %p240_p5, %s3358_s29, %s242_s25  }
  0x2d   : > { %s3578_s16 = sshll.u32 %s627_s17, 5  ;;  %s4196_s15 = sshll.u32 %s3382_s21, 9 }
  0x2e   : > { %4249 = sst [smem:[#allocation25_spill]] %s3576_s20  ;;  %s4250_s7 = sld [smem:[#allocation37_spill]] }
  0x2f   : > { %s629_s23 = scalar_lea.vmem [#allocation5], %s3578_s16  ;;  %p3591_p6 = pnand %p4198_p4, %p251_p3 }
  0x30   : > { %s636_s26 = sshll.u32 %s629_s23, 4  ;;  %s3597_s17 = scalar_lea.sflag [#allocation6], %s625_s18  ;;  %s3595_s26 = int_to_ptr.vmem [resolvable:$true] %s636_s26 }
  0x31   : > { %p4200_p8 = pneg %p3591_p6 }
  0x34   : > { %s3586_s12 = scalar_lea.hbm %s4250_s7, %s4196_s15  ;;  %s3147_s15 = scalar_lea.hbm %s4250_s7, 1024 }
  0x35   : > { %s3142_s13 = scalar_lea.hbm %s3586_s12, 512  ;;  %p3148_p11 = scmp.lt.u32.totalorder %s3586_s12, %s4250_s7 }
  0x36   : > { %p3143_p7 = scmp.ne.s32.totalorder %s3586_s12, %s3142_s13  ;;  %p3149_p12 = scmp.lt.u32.totalorder %s3147_s15, %s3142_s13 }
  0x37   : > { %p3151_p2 = scmp.lt.u32.totalorder %s3142_s13, %s3586_s12 }
  0x38   : > { %p3145_p9 = pnand %p4200_p8, %p3143_p7  ;;  %p3150_p13 = por %p3149_p12, %p3148_p11 }
  0x3a   : > { %p3146_p10 = pneg %p3145_p9  ;;  %p3152_p3 = por %p3151_p2, %p3150_p13 }
  0x3c   : > { %p3153_p5 = pnand %p3152_p3, %p3146_p10 }
  0x3e   : > { %3156 = shalt.err (!%p3153_p5)
}
  0x3f   : > { %s3157_s18 = scalar_lea.vmem %s3595_s26, 512  ;;  %s3392_s14 = smov [#allocation5]  }
  0x40   : > { %p3158_p7 = scmp.ne.s32.totalorder %s3595_s26, %s3157_s18  ;;  %s3162_s23 = sshll.u32 %s3392_s14, 4  ;;  %s3163_s23 = int_to_ptr.vmem [resolvable:$false] %s3162_s23 }
  0x41   : > { %s3164_s29 = scalar_lea.vmem %s3163_s23, 1024  ;;  %p3165_p0 = scmp.lt.s32.totalorder %s3595_s26, %s3163_s23 }
  0x42   : > { %p3160_p9 = pnand %p3158_p7, %p4200_p8  ;;  %p3166_p11 = scmp.lt.s32.totalorder %s3164_s29, %s3157_s18 }
  0x44   : > { %p3161_p4 = pneg %p3160_p9  ;;  %p3167_p12 = por %p3166_p11, %p3165_p0 }
  0x46   : > { %p3168_p13 = pnand %p3167_p12, %p3161_p4 }
  0x48   : > { %3171 = shalt.err (!%p3168_p13)
}
  0x49   : > { %s4201_s15 = smov 128   ;;  %s4202_s20 = smov 8  }
  0x4a   : > { %3013 = dma.hbm_to_vmem [thread:$0]  (!%p3591_p6), %s3586_s12, 512, %s3595_s26, %s3597_s17, %s4201_s15, %s4201_s15, %s4202_s20  }
  0x4b   : > { %p255_p0 = scmp.ne.s32.totalorder %s3354_s28, %s3350_s27  ;;  %s4252_s13 = sshll.u32 %s3382_s21, 9 }
  0x4c   : > { %s4253_s9 = sld [smem:[#allocation39_spill]]  ;;  %p2726_p4 = scmp.ge.s32.totalorder %s3390_s2, 1 }
  0x4d   : > { %s656_s29 = scalar_lea.vmem [#allocation7], %s3578_s16  ;;  %p715_p10 = scmp.lt.s32.totalorder %s3390_s2, 5 }
  0x4e   : > { %s663_s7 = sshll.u32 %s656_s29, 4  ;;  %s3645_s12 = sadd.s32 4294967295, %s3390_s2   ;;  %s3712_s7 = int_to_ptr.vmem [resolvable:$true] %s663_s7 }
  0x4f   : > { %p3640_p2 = pnand %p2726_p4, %p715_p10  ;;  %s2715_s26 = sadd.s32 4294967294, %s3390_s2  }
  0x50   : > { %s60_s16 = sadd.s32 1, %s3370_s19  ;;  %p67_p3 = scmp.ne.s32.totalorder %s3370_s19, %s3366_s0 }
  0x51   : > { %s4254_s11 = scalar_select %p3640_p2, 1, 0 }
  0x52   : > { %s3635_s23 = scalar_lea.hbm %s4253_s9, %s4252_s13  ;;  %s53_s13 = sadd.s32 1, %s3386_s22 }
  0x53   : > { %s4328_s13 = smov (!%p3557_p1, %s53_s13), %s3386_s22  ;;  %p73_p7 = scmp.ne.s32.totalorder %s3366_s0, %s3362_s30 }
  0x54   : > { %p55_p5 = scmp.ge.s32.totalorder %s4328_s13, 2  ;;  %p4255_p9 = scmp.eq.s32.totalorder %s3390_s2, 0 }
  0x55   : > { %p74_p12 = scmp.eq.s32.totalorder %s3645_s12, 0  ;;  %p513_p4 = scmp.eq.s32.totalorder %s3645_s12, 3 }
  0x56   : > { %p3659_p11 = por %p4255_p9, %p67_p3  ;;  %s4330_s13 = smov (%p55_p5, %s4328_s13), 0 }
  0x57   : > { %4257 = sst [smem:[#allocation26_spill]] %s4330_s13  ;;  %p3669_p1 = por %p74_p12, %p73_p7 }
  0x58   : > { %p3676_p13 = por %p255_p0, %p74_p12  ;;  %s57_s29 = ssub.s32 %s3386_s22, %s4330_s13 }
  0x59   : > { %s4258_s24 = scalar_select %p3669_p1, 1, 0 }
  0x5a   : > { %s4259_s14 = scalar_select %p3676_p13, 1, 0 }
  0x5b   : > { %p58_p10 = scmp.eq.s32.totalorder %s57_s29, 0  ;;  %p519_p9 = scmp.eq.s32.totalorder %s2715_s26, 3 }
  0x5c   : > { %p3683_p8 = por %p513_p4, %p67_p3  ;;  %s565_s20 = sand.u32 1, %s3370_s19  }
  0x5d   : > { %s3689_s21 = scalar_select %p58_p10, %s3370_s19, %s60_s16  }
  0x5e   : > { %s4260_s15 = scalar_select %p3683_p8, 1, 0 }
  0x5f   : > { %4262 = sst [smem:[#allocation28_spill]] %s3689_s21  ;;  %p3694_p5 = por %p519_p9, %p73_p7 }
  0x60   : > { %4261 = sst [smem:[#allocation27_spill]] %s4260_s15  ;;  %s2718_s27 = sshll.u32 %s565_s20, 3 }
  0x61   : > { %s4263_s10 = scalar_select %p3694_p5, 1, 0 }
  0x62   : > { %s2719_s8 = sshll.u32 %s3386_s22, 7  ;;  %s4265_s13 = sld [smem:[#allocation30_spill]] }
  0x63   : > { %4264 = sst [smem:[#allocation29_spill]] %s4263_s10  ;;  %s569_s26 = scalar_lea.vmem [#allocation2], %s2718_s27 }
  0x64   : > { %s576_s29 = sshll.u32 %s569_s26, 4  ;;  %p4266_p0 = scmp.lt.s32.totalorder %s3390_s2, 4  ;;  %s3714_s29 = int_to_ptr.vmem [resolvable:$true] %s576_s29 }
  0x65   : > { %s566_s5 = scalar_lea.sflag [#allocation3], %s565_s20 }
  0x66   : > { %p3708_p3 = pnand %p4266_p0, %p3659_p11 }
  0x68   : > { %s3702_s4 = scalar_lea.hbm %s4265_s13, %s2719_s8  ;;  %p3174_p12 = pneg %p3708_p3 }
  0x69   : > { %s3172_s6 = scalar_lea.hbm %s3702_s4, 128  ;;  %s3177_s27 = scalar_lea.hbm %s4265_s13, 256 }
  0x6a   : > { %p3173_p7 = scmp.ne.s32.totalorder %s3702_s4, %s3172_s6  ;;  %p3178_p11 = scmp.lt.u32.totalorder %s3702_s4, %s4265_s13 }
  0x6b   : > { %p3179_p9 = scmp.lt.u32.totalorder %s3177_s27, %s3172_s6  ;;  %p3181_p5 = scmp.lt.u32.totalorder %s3172_s6, %s3702_s4 }
  0x6c   : > { %p3175_p4 = pnand %p3174_p12, %p3173_p7 }
  0x6d   : > { %p3180_p0 = por %p3179_p9, %p3178_p11 }
  0x6e   : > { %p3176_p10 = pneg %p3175_p4 }
  0x6f   : > { %p3182_p8 = por %p3181_p5, %p3180_p0 }
  0x71   : > { %p3183_p13 = pnand %p3182_p8, %p3176_p10 }
  0x73   : > { %3186 = shalt.err (!%p3183_p13)
}
  0x74   : > { %s3187_s20 = scalar_lea.vmem %s3714_s29, 128  ;;  %s3395_s8 = smov [#allocation2]  }
  0x75   : > { %p3188_p7 = scmp.ne.s32.totalorder %s3714_s29, %s3187_s20  ;;  %s3192_s18 = sshll.u32 %s3395_s8, 4  ;;  %s3193_s18 = int_to_ptr.vmem [resolvable:$false] %s3192_s18 }
  0x76   : > { %s3194_s22 = scalar_lea.vmem %s3193_s18, 256  ;;  %p3195_p2 = scmp.lt.s32.totalorder %s3714_s29, %s3193_s18 }
  0x77   : > { %p3190_p4 = pnand %p3188_p7, %p3174_p12  ;;  %p3196_p11 = scmp.lt.s32.totalorder %s3194_s22, %s3187_s20 }
  0x79   : > { %p3191_p1 = pneg %p3190_p4  ;;  %p3197_p9 = por %p3196_p11, %p3195_p2 }
  0x7b   : > { %p3198_p5 = pnand %p3197_p9, %p3191_p1 }
  0x7d   : > { %3201 = shalt.err (!%p3198_p5)
}
  0x7e   : > { %3010 = dma.hbm_to_vmem [thread:$0]  (!%p3708_p3), %s3702_s4, 128, %s3714_s29, %s566_s5  }
  0x7f   : > { %s3202_s6 = scalar_lea.hbm %s3635_s23, 512  ;;  %p4268_p13 = pneg %p3591_p6 }
  0x80   : > { %p3203_p8 = scmp.ne.s32.totalorder %s3635_s23, %s3202_s6  ;;  %s3207_s20 = scalar_lea.hbm %s4253_s9, 1024 }
  0x81   : > { %p3208_p2 = scmp.lt.u32.totalorder %s3635_s23, %s4253_s9  ;;  %p3209_p1 = scmp.lt.u32.totalorder %s3207_s20, %s3202_s6 }
  0x82   : > { %p3205_p12 = pnand %p3203_p8, %p4268_p13  ;;  %p3211_p7 = scmp.lt.u32.totalorder %s3202_s6, %s3635_s23 }
  0x83   : > { %p3210_p0 = por %p3209_p1, %p3208_p2 }
  0x84   : > { %p3206_p10 = pneg %p3205_p12 }
  0x85   : > { %p3212_p4 = por %p3211_p7, %p3210_p0 }
  0x87   : > { %p3213_p11 = pnand %p3212_p4, %p3206_p10 }
  0x89   : > { %3216 = shalt.err (!%p3213_p11)
}
  0x8a   : > { %s3217_s4 = scalar_lea.vmem %s3712_s7, 512  ;;  %p4269_p9 = pmov %p4268_p13 }
  0x8b   : > { %p3218_p3 = scmp.ne.s32.totalorder %s3712_s7, %s3217_s4  ;;  %s3396_s29 = smov [#allocation7]  }
  0x8c   : > { %s3222_s5 = sshll.u32 %s3396_s29, 4  ;;  %s3223_s5 = int_to_ptr.vmem [resolvable:$false] %s3222_s5 }
  0x8d   : > { %p3220_p5 = pnand %p3218_p3, %p4269_p9  ;;  %s3224_s18 = scalar_lea.vmem %s3223_s5, 1024 }
  0x8e   : > { %p3225_p13 = scmp.lt.s32.totalorder %s3712_s7, %s3223_s5  ;;  %p3226_p12 = scmp.lt.s32.totalorder %s3224_s18, %s3217_s4 }
  0x8f   : > { %p3221_p8 = pneg %p3220_p5 }
  0x90   : > { %p3227_p2 = por %p3226_p12, %p3225_p13 }
  0x92   : > { %p3228_p1 = pnand %p3227_p2, %p3221_p8 }
  0x94   : > { %3231 = shalt.err (!%p3228_p1)
}
  0x95   : > { %s4270_s22 = smov 8   ;;  %s4271_s6 = smov 128  }
  0x96   : > { %3016 = dma.hbm_to_vmem [thread:$0]  (!%p3591_p6), %s3635_s23, 512, %s3712_s7, %s3597_s17, %s4271_s6, %s4271_s6, %s4270_s22  }
  0x97   : > { %p4272_p10 = scmp.ne.s32.totalorder %s4254_s11, 0 }
  0x98   : > { %s3771_s27 = sand.u32 (!%p4272_p10), 1, %s3366_s0   ;;  %p4273_p0 = scmp.ne.s32.totalorder (!%p4272_p10), %s4258_s24, 0 }
  0x99   : > { %719 = sbr.rel (%p4272_p10) target bundleno = 3886 (0xf2e), region = 88  ;;  %s3774_s26 = sshll.u32 (!%p4272_p10), %s3771_s27, 3 }
  0x9a   : > { %s722_s25 = scalar_lea.sflag (!%p4272_p10), [#allocation3], %s3771_s27 }
  0xa0   : > { %3333 = dma.done.wait (%p4273_p0), %s722_s25, 128  }
  0xa1   : > { %3335 = vsyncadd (%p4273_p0), %s722_s25, 4294967168  ;;  %s730_s7 = sand.u32 1, %s3645_s12   ;;  %s732_s11 = sand.u32 1, %s3354_s28  }
  0xa2   : > { %s2728_s17 = sshll.u32 %s732_s11, 5  ;;  %s731_s23 = scalar_lea.sflag [#allocation6], %s730_s7 }
  0xa3   : > { %s3784_s8 = scalar_lea.vmem [#allocation5], %s2728_s17  ;;  %p4274_p6 = scmp.ne.s32.totalorder %s4259_s14, 0 }
  0xa5   : > { %3337 = dma.done.wait (%p4274_p6), %s731_s23, 1024  }
  0xa6   : > { %3339 = vsyncadd (%p4274_p6), %s731_s23, 4294966272  ;;  %p861_p7 = scmp.lt.s32.totalorder %s3374_s1, 1  ;;  %s4276_s22 = sld [smem:[#allocation31_spill]] }
  0xa7   : > { %s4277_s3 = sld [smem:[#allocation33_spill]]  ;;  %s4279_s24 = sld [smem:[#allocation35_spill]] }
  0xa8   : > { %s3792_s16 = scalar_select %p861_p7, %s3374_s1, 1 }
  0xa9   : > { %s4283_s23 = sld [smem:[#allocation41_spill]]  ;;  %s4285_s18 = sld [smem:[#allocation43_spill]] }
  0xaa   : > { %s2781_s12 = sshll.u32 %s3792_s16, 5  ;;  %s2784_s2 = sshll.u32 %s3792_s16, 6 }
  0xab   : > { %s4286_s29 = sld [smem:[#allocation44_spill]]  ;;  %s4287_s7 = sld [smem:[#allocation45_spill]] }
  0xac   : > { %s3802_s6 = scalar_lea.vmem %s4276_s22, %s2781_s12  ;;  %s3859_s19 = scalar_lea.vmem [#allocation8], %s3774_s26 }
  0xad   : > { %s3807_s11 = scalar_lea.vmem %s4277_s3, %s2781_s12  ;;  %s3816_s14 = scalar_lea.vmem %s4279_s24, %s2781_s12 }
  0xae   : > { %s4284_s12 = sld [smem:[#allocation42_spill]]  ;;  %s860_s21 = scalar_lea.vmem [#allocation9], %s3774_s26 }
  0xaf   : > { %s3834_s13 = scalar_lea.vmem %s4283_s23, %s2784_s2  ;;  %s901_s22 = scalar_lea.vmem %s4285_s18, %s3792_s16 }
  0xb0   : > { %s4288_s2 = sld [smem:[#allocation46_spill]]  ;;  %s3856_s23 = scalar_lea.vmem [#allocation7], %s2728_s17 }
  0xb1   : > { %s904_s25 = scalar_lea.vmem %s4286_s29, %s3792_s16  ;;  %s907_s30 = scalar_lea.vmem %s4287_s7, %s3792_s16 }
  0xb2   : > { %p2740_p4 = scmp.ne.s32.totalorder %s3374_s1, 0 }
  0xb3   : > { %vm916_vm0 = vcmask (!%p2740_p4), 261120  }
  0xb4   : > { %s898_s24 = scalar_lea.vmem %s4284_s12, %s3792_s16  ;;  %914 = sbr.rel (%p2740_p4) target bundleno = 187 (0xbb), region = 104 }
  0xb5   : > { %s4289_s12 = scalar_lea.vmem (!%p2740_p4), [#allocation2], %s3774_s26 }
  0xb6   : > { %s910_s9 = scalar_lea.vmem %s4288_s2, %s3792_s16  ;;  %v915_v0 = vld [vmem:[%s4289_s12] sm:$0xff] (!%p2740_p4) }
  0xb7   : > { %917 = vst.msk [vmem:[%s3859_s19] sm:$0xff] (!%p2740_p4), %vm916_vm0, %v915_v0 }
  0xbb PF: > { %v923_v1 = vld [vmem:[%s3807_s11] sm:$0xff]  ;;  %v924_v2 = vld [vmem:[%s3807_s11 + $0x8] sm:$0xff]  ;;  %v3397_v4 = vmov 0.0|0.0   ;;  %v925_v7 = vld [vmem:[%s3807_s11 + $0x10] sm:$0xff]  ;;  %vm3398_vm1 = vmmov 0   ;;  %v3399_v12 = vmov 0.0  }
  0xbc   : > { %v919_v3 = vld [vmem:[%s3802_s6] sm:$0xff]  ;;  %2967 = vmatprep.subr.bf16.mxu1 %v3397_v4  ;;  %2961 = vmatprep.subr.bf16.mxu0 %v3397_v4  ;;  %v2968_v5 = vpack.c.bf16 %v924_v2, %v923_v1  ;;  %v920_v6 = vld [vmem:[%s3802_s6 + $0x8] sm:$0xff]  ;;  %v926_v8 = vld [vmem:[%s3807_s11 + $0x18] sm:$0xff]  ;;  %vm942_vm2 = vcmask 261120   ;;  %s4292_s5 = sld [smem:[#allocation32_spill]]  ;;  %vm1171_vm3 = vcmask 64512  }
  0xbd   : > { %v2962_v9 = vpack.c.bf16 %v920_v6, %v919_v3  ;;  %v921_v10 = vld [vmem:[%s3802_s6 + $0x10] sm:$0xff]  ;;  %v922_v11 = vld [vmem:[%s3802_s6 + $0x18] sm:$0xff]  ;;  %2857 = vmatprep.mubr.msk.f32.mxu1 %vm3398_vm1, %v3399_v12  ;;  %2846 = vmatprep.mubr.msk.f32.mxu0 %vm3398_vm1, %v3399_v12  ;;  %v2971_v13 = vpack.c.bf16 %v926_v8, %v925_v7  ;;  %v927_v15 = vld [vmem:[%s3816_s14] sm:$0xff]  ;;  %s4290_s6 = sld [smem:[#allocation34_spill]]  ;;  %s3400_s0 = smov 120   ;;  %vm2277_vm4 = vcmask 523264  }
  0xbe   : > { %2969 = vmatpush3.bf16.msra.mxu1 %v2968_v5  ;;  %v2965_v14 = vpack.c.bf16 %v922_v11, %v921_v10  ;;  %v928_v16 = vld [vmem:[%s3816_s14 + $0x8] sm:$0xff]  ;;  %v3885_v17 = vld [vmem:[%s3859_s19] sm:$0xff]  ;;  %s4294_s3 = sld [smem:[#allocation36_spill]]  ;;  %s3401_s7 = smov 112  }
  0xbf   : > { %2963 = vmatpush3.bf16.msra.mxu0 %v2962_v9  ;;  %2970 = vmatprep.subr.bf16.mxu1 %v3397_v4  ;;  %v2974_v18 = vpack.c.bf16 %v928_v16, %v927_v15  ;;  %v929_v19 = vld [vmem:[%s3816_s14 + $0x10] sm:$0xff]  ;;  %v930_v20 = vld [vmem:[%s3816_s14 + $0x18] sm:$0xff]  ;;  %s3402_s20 = smov 104   ;;  %s4296_s12 = sld [smem:[#allocation38_spill]] }
  0xc0   : > { %2964 = vmatprep.subr.bf16.mxu0 %v3397_v4  ;;  %v2977_v21 = vpack.c.bf16 %v930_v20, %v929_v19  ;;  %v932_v59 = vld [vmem:[%s3784_s8 + $0x8] sm:$0xff]  ;;  %v931_v3 = vld [vmem:[%s3784_s8] sm:$0xff]  ;;  %p2772_p11 = scmp.ne.s32.totalorder %s3374_s1, 1 }
  0xc2   : > { %2972 = vmatpush3.bf16.msra.mxu1 %v2971_v13  ;;  %s4293_s18 = scalar_lea.vmem %s4292_s5, %s3792_s16 }
  0xc3   : > { %2966 = vmatpush3.bf16.msra.mxu0 %v2965_v14  ;;  %2876 = vmatprep.subr.mxu1 %v3399_v12  ;;  %s4291_s11 = scalar_lea.vmem %s4290_s6, %s3792_s16  ;;  %v2741_v23 = vld [vmem:[%s4293_s18] ss:$0 sm:$0xff] }
  0xc4   : > { %2973 = vmatprep.subr.bf16.mxu0 %v3397_v4  ;;  %v2743_v22 = vld [vmem:[%s4291_s11] ss:$0 sm:$0xff]  ;;  %s4295_s10 = scalar_lea.vmem %s4294_s3, %s3792_s16 }
  0xc5   : > { %2858 = vmatmul.mubr.msk.f32.vlgmr.msra.gmra.mrb[0].mxu1 %vm942_vm2, %v3885_v17  ;;  %v2745_v31 = vld [vmem:[%s4295_s10] ss:$0 sm:$0xff]  ;;  %s4297_s15 = scalar_lea.vmem %s4296_s12, %s3792_s16 }
  0xc6   : > { %2847 = vmatmul.mubr.msk.f32.vlgmr.msra.gmra.mrb[0].mxu0 %vm942_vm2, %v3885_v17  ;;  %2878 = vmatprep.mubr.msk.f32.mxu1 %vm3398_vm1, %v3399_v12 }
  0xc7   : > { %2975 = vmatpush3.bf16.msra.mxu0 %v2974_v18  ;;  %2868 = vmatprep.mubr.msk.f32.mxu0 %vm3398_vm1, %v3399_v12 }
  0xc8   : > { %2976 = vmatprep.subr.bf16.mxu0 %v3397_v4 }
  0xcb   : > { %2978 = vmatpush3.bf16.msra.mxu0 %v2977_v21 }
  0xcc   : > { %2871 = vmatprep.subr.mxu0 %v3399_v12 }
  0xce   : > { %2869 = vmatmul.mubr.msk.f32.vlgmr.msra.gmra.mrb[2].mxu0 %vm942_vm2, %v3885_v17 }
  0xcf   : > { %2873 = vmatprep.mubr.msk.f32.mxu0 %vm3398_vm1, %v3399_v12 }
 0x198   : > { %v1089_v24 = vpop.f32.mrb[0].mxu1 }
 0x199   : > { %v3915_v25 = vadd.f32 %v2743_v22, %v1089_v24  ;;  %v1012_v26 = vpop.f32.mrb[0].mxu0  ;;  %v2859_v27 = vpop.f32.mrb[1].mxu1 }
 0x19a   : > { %v1013_v28 = vadd.f32 %v2741_v23, %v1012_v26  ;;  %v2848_v29 = vpop.f32.mrb[1].mxu0 }
 0x19b   : > { %1338 = vrot.lane.b32.xlu0 %v3915_v25, %s3400_s0  ;;  %2872 = vmatpush3.xpose.msk.msra.mxu0 %vm1171_vm3, %v3915_v25 }
 0x19c   : > { %v3921_v30 = vmul.f32 0.35355338, %v1013_v28  ;;  %2881 = vmatprep.subr.mxu0 %v3399_v12 }
 0x19e   : > { %2874 = vmatmul.mubr.msk.f32.vlgmr.msra.gmra.mrb[4].mxu0 %vm1171_vm3, %v3921_v30 }
 0x19f   : > { %1336 = vrot.lane.b32.xlu0 %v3921_v30, %s3400_s0  ;;  %2883 = vmatprep.mubr.msk.f32.mxu0 %vm3398_vm1, %v3399_v12 }
 0x1a1   : > { %v1166_v32 = vpop.f32.mrb[2].mxu0 }
 0x1a2   : > { %v3935_v33 = vadd.f32 %v2745_v31, %v1166_v32  ;;  %v2870_v34 = vpop.f32.mrb[3].mxu0 }
 0x1a4   : > { %2877 = vmatpush3.msra.mxu1 %v3935_v33 }
 0x1a5   : > { %2886 = vmatprep.subr.mxu1 %v3399_v12 }
 0x20d   : > { %v1339_v35 = vpop.permute.xlu0 %1338 }
 0x20e   : > { %2882 = vmatpush3.xpose.msk.msra.mxu0 %vm1171_vm3, %v1339_v35 }
 0x20f   : > { %2891 = vmatprep.subr.mxu0 %v3399_v12 }
 0x211   : > { %v1337_v36 = vpop.permute.xlu0 %1336 }
 0x212   : > { %2884 = vmatmul.mubr.msk.f32.vlgmr.msra.gmra.mrb[6].mxu0 %vm1171_vm3, %v1337_v36 }
 0x213   : > { %2893 = vmatprep.mubr.msk.f32.mxu0 %vm3398_vm1, %v3399_v12  ;;  %2892 = vmatpush3.msra.mxu0 %v932_v59 }
 0x214   : > { %2901 = vmatprep.subr.mxu0 %v3399_v12 }
 0x271   : > { %v1244_v37 = vpop.f32.mrb[4].mxu0 }
 0x272   : > { %v2875_v38 = vpop.f32.mrb[5].mxu0  ;;  %v1248_v39 = vsel %vm1171_vm3, %v1244_v37, -inf }
 0x273   : > { %1249 = vmax.xlane.f32.xlu1 %v1248_v39 }
 0x2e5   : > { %v1410_v40 = vpop.f32.mrb[6].mxu0 }
 0x2e6   : > { %v2885_v41 = vpop.f32.mrb[7].mxu0  ;;  %v1414_v42 = vsel %vm1171_vm3, %v1410_v40, -inf }
 0x2e7   : > { %1415 = vmax.xlane.f32.xlu1 %v1414_v42 }
 0x300   : > { %v1250_v43 = vpop.xlane.xlu1 %1249 }
 0x301   : > { %v1251_v44 = vsub.f32 %v1244_v37, %v1250_v43 }
 0x303   : > { %v1252_v45 = vmul.f32 1.442695, %v1251_v44 }
 0x305   : > { %3122 = vpow2.f32 %v1252_v45 }
 0x30f   : > { %v3123_v46 = vpop.eup %3122 }
 0x310   : > { %v1254_v47 = vsel %vm1171_vm3, %v3123_v46, 0.0 }
 0x311   : > { %1255 = vadd.xlane.f32.xlu0 %v1254_v47 }
 0x374   : > { %v1416_v48 = vpop.xlane.xlu1 %1415 }
 0x375   : > { %v1417_v49 = vsub.f32 %v1410_v40, %v1416_v48 }
 0x377   : > { %v1418_v50 = vmul.f32 1.442695, %v1417_v49  ;;  %v934_v49 = vld [vmem:[%s3784_s8 + $0x18] sm:$0xff] }
 0x379   : > { %3124 = vpow2.f32 %v1418_v50 }
 0x383   : > { %v3125_v51 = vpop.eup %3124 }
 0x384   : > { %v1420_v52 = vsel %vm1171_vm3, %v3125_v51, 0.0 }
 0x385   : > { %1421 = vadd.xlane.f32.xlu1 %v1420_v52 }
 0x396   : > { %1430 = vrot.lane.b32.xlu1 %v3935_v33, %s3400_s0  ;;  %s4300_s0 = sld [smem:[#allocation40_spill]] }
 0x39a   : > { %1654 = vrot.lane.b32.xlu1 %v3915_v25, %s3401_s7 }
 0x39c   : > { %s4301_s28 = scalar_lea.vmem %s4300_s0, %s3792_s16 }
 0x39e   : > { %v1256_v53 = vpop.xlane.xlu0 %1255  ;;  %1652 = vrot.lane.b32.xlu1 %v3921_v30, %s3401_s7 }
 0x39f   : > { %3126 = vrcp.f32 %v1256_v53 }
 0x3a9   : > { %v3127_v54 = vpop.eup %3126 }
 0x3aa   : > { %v1258_v55 = vmul.f32 %v3127_v54, %v1256_v53 }
 0x3ac   : > { %v1259_v56 = vsub.f32 2.0, %v1258_v55 }
 0x3ae   : > { %v1260_v57 = vmul.f32 %v3127_v54, %v1259_v56 }
 0x3b0   : > { %v3954_v58 = vmul.f32 %v3123_v46, %v1260_v57 }
 0x3b2   : > { %2879 = vmatmul.mubr.msk.f32.vlgmr.msra.gmra.mrb[2].mxu1 %vm1171_vm3, %v3954_v58 }
 0x3b3   : > { %2888 = vmatprep.mubr.msk.f32.mxu1 %vm3398_vm1, %v3399_v12 }
 0x412   : > { %v1422_v60 = vpop.xlane.xlu1 %1421 }
 0x413   : > { %3128 = vrcp.f32 %v1422_v60 }
 0x416   : > { %v1431_v61 = vpop.permute.xlu1 %1430 }
 0x417   : > { %2887 = vmatpush3.msra.mxu1 %v1431_v61 }
 0x418   : > { %2896 = vmatprep.subr.mxu1 %v3399_v12 }
 0x41a   : > { %v1655_v7 = vpop.permute.xlu1 %1654 }
 0x41d   : > { %v3129_v62 = vpop.eup %3128 }
 0x41e   : > { %v1424_v63 = vmul.f32 %v3129_v62, %v1422_v60  ;;  %v1653_v10 = vpop.permute.xlu1 %1652 }
 0x420   : > { %v1425_v0 = vsub.f32 2.0, %v1424_v63  ;;  %v2763_v63 = vld [vmem:[%s4297_s15] ss:$0 sm:$0xff] }
 0x422   : > { %v1426_v1 = vmul.f32 %v3129_v62, %v1425_v0 }
 0x424   : > { %v1427_v2 = vmul.f32 %v3125_v51, %v1426_v1 }
 0x426   : > { %2889 = vmatmul.mubr.msk.f32.vlgmr.msra.gmra.mrb[4].mxu1 %vm1171_vm3, %v1427_v2  ;;  %v1428_v36 = vadd.f32 %v1427_v2, %v3954_v58 }
 0x427   : > { %2897 = vmatpush3.msra.mxu1 %v931_v3  ;;  %2898 = vmatprep.mubr.msk.f32.mxu1 %vm3398_vm1, %v3399_v12 }
 0x428   : > { %2906 = vmatprep.subr.mxu1 %v3399_v12 }
 0x485   : > { %v1332_v5 = vpop.f32.mrb[2].mxu1 }
 0x486   : > { %v2880_v6 = vpop.f32.mrb[3].mxu1  ;;  %2899 = vmatmul.mubr.msk.f32.vlgmr.msra.gmra.mrb[6].mxu1 %vm1171_vm3, %v1332_v5 }
 0x487   : > { %2908 = vmatprep.mubr.msk.f32.mxu1 %vm3398_vm1, %v3399_v12 }
 0x4f9   : > { %v1502_v8 = vpop.f32.mrb[4].mxu1 }
 0x4fa   : > { %v2890_v9 = vpop.f32.mrb[5].mxu1  ;;  %2894 = vmatmul.mubr.msk.f32.vlgmr.msra.gmra.mrb[8].mxu0 %vm1171_vm3, %v1502_v8 }
 0x4fb   : > { %2902 = vmatpush3.xpose.msk.msra.mxu0 %vm1171_vm3, %v1655_v7  ;;  %2903 = vmatprep.mubr.msk.f32.mxu0 %vm3398_vm1, %v3399_v12 }
 0x4fc   : > { %2911 = vmatprep.subr.mxu0 %v3399_v12 }
 0x4fe   : > { %2904 = vmatmul.mubr.msk.f32.vlgmr.msra.gmra.mrb[10].mxu0 %vm1171_vm3, %v1653_v10  ;;  %v2177_v10 = vld [vmem:[%s3856_s23] sm:$0xff] }
 0x4ff   : > { %2913 = vmatprep.mubr.msk.f32.mxu0 %vm3398_vm1, %v3399_v12 }
 0x559   : > { %v1648_v11 = vpop.f32.mrb[6].mxu1 }
 0x55a   : > { %v2900_v13 = vpop.f32.mrb[7].mxu1 }
 0x5cd   : > { %v1575_v14 = vpop.f32.mrb[8].mxu0 }
 0x5ce   : > { %v1649_v15 = vadd.f32 %v1648_v11, %v1575_v14  ;;  %v2895_v16 = vpop.f32.mrb[9].mxu0  ;;  %v2178_v11 = vld [vmem:[%s3856_s23 + $0x8] sm:$0xff]  ;;  %v2180_v14 = vld [vmem:[%s3856_s23 + $0x18] sm:$0xff] }
 0x5cf   : > { %v2980_v13 = vpack.c.bf16 %v2178_v11, %v2177_v10  ;;  %v2262_v16 = vld [vmem:[%s3834_s13] sm:$0xff] }
 0x5d1   : > { %v1726_v18 = vpop.f32.mrb[10].mxu0 }
 0x5d2   : > { %v2905_v19 = vpop.f32.mrb[11].mxu0  ;;  %v1730_v20 = vsel %vm1171_vm3, %v1726_v18, -inf }
 0x5d3   : > { %1731 = vmax.xlane.f32.xlu1 %v1730_v20  ;;  %v2264_v19 = vld [vmem:[%s3834_s13 + $0x10] sm:$0xff] }
 0x660   : > { %v1732_v21 = vpop.xlane.xlu1 %1731 }
 0x661   : > { %v1733_v22 = vsub.f32 %v1726_v18, %v1732_v21  ;;  %v2263_v18 = vld [vmem:[%s3834_s13 + $0x8] sm:$0xff]  ;;  %v2265_v21 = vld [vmem:[%s3834_s13 + $0x18] sm:$0xff] }
 0x662   : > { %v2986_v20 = vpack.c.bf16 %v2263_v18, %v2262_v16 }
 0x663   : > { %v1734_v23 = vmul.f32 1.442695, %v1733_v22  ;;  %v2989_v22 = vpack.c.bf16 %v2265_v21, %v2264_v19 }
 0x665   : > { %3130 = vpow2.f32 %v1734_v23  ;;  %v2266_v23 = vld [vmem:[%s3834_s13 + $0x20] sm:$0xff] }
 0x66f   : > { %v3131_v24 = vpop.eup %3130 }
 0x670   : > { %v1736_v26 = vsel %vm1171_vm3, %v3131_v24, 0.0 }
 0x671   : > { %1737 = vadd.xlane.f32.xlu0 %v1736_v26 }
 0x687   : > { %1745 = vrot.lane.b32.xlu0 %v3935_v33, %s3401_s7 }
 0x68b   : > { %1897 = vrot.lane.b32.xlu0 %v3915_v25, %s3402_s20 }
 0x68f   : > { %1895 = vrot.lane.b32.xlu0 %v3921_v30, %s3402_s20  ;;  %v933_v30 = vld [vmem:[%s3784_s8 + $0x10] sm:$0xff] }
 0x690   : > { %2912 = vmatpush3.msra.mxu0 %v933_v30  ;;  %v2766_v30 = vld [vmem:[%s4301_s28] ss:$0 sm:$0xff] }
 0x691   : > { %2921 = vmatprep.subr.mxu0 %v3399_v12 }
 0x6fe   : > { %v1738_v27 = vpop.xlane.xlu0 %1737 }
 0x6ff   : > { %3132 = vrcp.f32 %v1738_v27 }
 0x702   : > { %v1746_v28 = vpop.permute.xlu0 %1745 }
 0x703   : > { %2907 = vmatpush3.msra.mxu1 %v1746_v28 }
 0x704   : > { %2916 = vmatprep.subr.mxu1 %v3399_v12 }
 0x706   : > { %v1898_v35 = vpop.permute.xlu0 %1897 }
 0x709   : > { %v3133_v29 = vpop.eup %3132 }
 0x70a   : > { %v1740_v31 = vmul.f32 %v3133_v29, %v1738_v27  ;;  %v1896_v25 = vpop.permute.xlu0 %1895 }
 0x70c   : > { %v1741_v32 = vsub.f32 2.0, %v1740_v31 }
 0x70e   : > { %v1742_v34 = vmul.f32 %v3133_v29, %v1741_v32  ;;  %v2764_v32 = vld [vmem:[%s901_s22] ss:$0 sm:$0xff] }
 0x710   : > { %v1743_v37 = vmul.f32 %v3131_v24, %v1742_v34  ;;  %v2267_v24 = vld [vmem:[%s3834_s13 + $0x28] sm:$0xff] }
 0x711   : > { %v2992_v26 = vpack.c.bf16 %v2267_v24, %v2266_v23 }
 0x712   : > { %v1744_v38 = vadd.f32 %v1743_v37, %v1428_v36  ;;  %2909 = vmatmul.mubr.msk.f32.vlgmr.msra.gmra.mrb[8].mxu1 %vm1171_vm3, %v1743_v37  ;;  %v2268_v37 = vld [vmem:[%s3834_s13 + $0x30] sm:$0xff] }
 0x713   : > { %2917 = vmatpush3.xpose.msk.msra.mxu1 %vm1171_vm3, %v1898_v35  ;;  %2918 = vmatprep.mubr.msk.f32.mxu1 %vm3398_vm1, %v3399_v12  ;;  %v2765_v35 = vld [vmem:[%s904_s25] ss:$0 sm:$0xff] }
 0x714   : > { %2926 = vmatprep.subr.mxu1 %v3399_v12 }
 0x716   : > { %2919 = vmatmul.mubr.msk.f32.vlgmr.msra.gmra.mrb[10].mxu1 %vm1171_vm3, %v1896_v25 }
 0x717   : > { %2928 = vmatprep.mubr.msk.f32.mxu1 %vm3398_vm1, %v3399_v12  ;;  %2927 = vmatpush3.msra.mxu1 %v934_v49 }
 0x718   : > { %2985 = vmatprep.subr.bf16.mxu1 %v3397_v4 }
 0x7e5   : > { %v1817_v39 = vpop.f32.mrb[8].mxu1 }
 0x7e6   : > { %v2910_v40 = vpop.f32.mrb[9].mxu1  ;;  %2914 = vmatmul.mubr.msk.f32.vlgmr.msra.gmra.mrb[12].mxu0 %vm1171_vm3, %v1817_v39 }
 0x7e7   : > { %2923 = vmatprep.mubr.msk.f32.mxu0 %vm3398_vm1, %v3399_v12 }
 0x7e9   : > { %v1969_v41 = vpop.f32.mrb[10].mxu1 }
 0x7ea   : > { %v2920_v42 = vpop.f32.mrb[11].mxu1  ;;  %v1973_v43 = vsel %vm1171_vm3, %v1969_v41, -inf }
 0x7eb   : > { %1974 = vmax.xlane.f32.xlu0 %v1973_v43  ;;  %v2768_v43 = vld [vmem:[%s898_s24] ss:$0 sm:$0xff] }
 0x878   : > { %v1975_v44 = vpop.xlane.xlu0 %1974 }
 0x879   : > { %v1976_v45 = vsub.f32 %v1969_v41, %v1975_v44 }
 0x87b   : > { %v1977_v46 = vmul.f32 1.442695, %v1976_v45 }
 0x87d   : > { %3134 = vpow2.f32 %v1977_v46 }
 0x887   : > { %v3135_v47 = vpop.eup %3134 }
 0x888   : > { %v1979_v48 = vsel %vm1171_vm3, %v3135_v47, 0.0 }
 0x889   : > { %1980 = vadd.xlane.f32.xlu1 %v1979_v48 }
 0x89a   : > { %1988 = vrot.lane.b32.xlu1 %v3935_v33, %s3402_s20 }
 0x8b9   : > { %v1890_v50 = vpop.f32.mrb[12].mxu0 }
 0x8ba   : > { %v1894_v51 = vadd.f32 %v1890_v50, %v1649_v15  ;;  %v2915_v52 = vpop.f32.mrb[13].mxu0 }
 0x916   : > { %v1981_v53 = vpop.xlane.xlu1 %1980 }
 0x917   : > { %3136 = vrcp.f32 %v1981_v53 }
 0x91a   : > { %v1989_v54 = vpop.permute.xlu1 %1988 }
 0x91b   : > { %2922 = vmatpush3.msra.mxu0 %v1989_v54 }
 0x91c   : > { %2979 = vmatprep.subr.bf16.mxu0 %v3397_v4 }
 0x921   : > { %v3137_v55 = vpop.eup %3136 }
 0x922   : > { %v1983_v56 = vmul.f32 %v3137_v55, %v1981_v53 }
 0x924   : > { %v1984_v57 = vsub.f32 2.0, %v1983_v56 }
 0x926   : > { %v1985_v58 = vmul.f32 %v3137_v55, %v1984_v57 }
 0x928   : > { %v1986_v59 = vmul.f32 %v3135_v47, %v1985_v58  ;;  %v2770_v58 = vld [vmem:[%s907_s30] ss:$0 sm:$0xff] }
 0x92a   : > { %v4009_v33 = vadd.f32 %v1986_v59, %v1744_v38  ;;  %2924 = vmatmul.mubr.msk.f32.vlgmr.msra.gmra.mrb[14].mxu0 %vm1171_vm3, %v1986_v59  ;;  %v2269_v38 = vld [vmem:[%s3834_s13 + $0x38] sm:$0xff] }
 0x92b   : > { %2939 = vmatprep.mubr.msk.f32.mxu0 %vm3398_vm1, %v3399_v12  ;;  %2981 = vmatpush3.bf16.msra.mxu0 %v2980_v13  ;;  %v2995_v25 = vpack.c.bf16 %v2269_v38, %v2268_v37 }
 0x92c   : > { %2982 = vmatprep.subr.bf16.mxu0 %v3397_v4 }
 0x9fd   : > { %v2060_v60 = vpop.f32.mrb[14].mxu0 }
 0x9fe   : > { %v2925_v61 = vpop.f32.mrb[15].mxu0  ;;  %2929 = vmatmul.mubr.msk.f32.vlgmr.msra.gmra.mrb[12].mxu1 %vm1171_vm3, %v2060_v60  ;;  %v2771_v60 = vld [vmem:[%s910_s9] ss:$0 sm:$0xff] }
 0x9ff   : > { %2958 = vmatprep.mubr.msk.f32.mxu1 %vm3398_vm1, %v3399_v12  ;;  %2987 = vmatpush3.bf16.msra.mxu1 %v2986_v20 }
 0xa00   : > { %2988 = vmatprep.subr.bf16.mxu1 %v3397_v4 }
 0xa03   : > { %2990 = vmatpush3.bf16.msra.mxu1 %v2989_v22 }
 0xa04   : > { %2991 = vmatprep.subr.bf16.mxu1 %v3397_v4 }
 0xa07   : > { %2993 = vmatpush3.bf16.msra.mxu1 %v2992_v26 }
 0xa08   : > { %2994 = vmatprep.subr.bf16.mxu1 %v3397_v4 }
 0xa0b   : > { %2996 = vmatpush3.bf16.msra.mxu1 %v2995_v25 }
 0xad1   : > { %v2133_v62 = vpop.f32.mrb[12].mxu1 }
 0xad2   : > { %v2137_v0 = vadd.f32 %v2133_v62, %v1894_v51  ;;  %v2930_v1 = vpop.f32.mrb[13].mxu1 }
 0xad4   : > { %v2145_v2 = vadd.f32 %v2763_v63, %v2137_v0  ;;  %v2386_v63 = vmul.f32 (!%p2772_p11), 0.25, %v4009_v33 }
 0xad6   : > { %v2146_v3 = vadd.f32 %v2145_v2, %v3885_v17  ;;  %v2179_v17 = vld [vmem:[%s3856_s23 + $0x10] sm:$0xff]  ;;  %2387 = vst.msk [vmem:[%s860_s21] sm:$0xff] (!%p2772_p11), %vm1171_vm3, %v2386_v63 }
 0xad7   : > { %v2983_v15 = vpack.c.bf16 %v2180_v14, %v2179_v17 }
 0xad8   : > { %v2149_v5 = vsel %vm942_vm2, %v2146_v3, 0.0 }
 0xad9   : > { %2150 = vadd.xlane.f32.xlu1 %v2149_v5  ;;  %2984 = vmatpush3.bf16.msra.mxu0 %v2983_v15 }
 0xb66   : > { %v2151_v6 = vpop.xlane.xlu1 %2150 }
 0xb67   : > { %v2153_v12 = vmul.f32 0.03125, %v2151_v6 }
 0xb69   : > { %v2154_v7 = vsub.f32 %v2146_v3, %v2153_v12 }
 0xb6b   : > { %v2155_v8 = vmul.f32 %v2154_v7, %v2154_v7 }
 0xb6d   : > { %v2156_v9 = vsel %vm942_vm2, %v2155_v8, 0.0 }
 0xb6e   : > { %2157 = vadd.xlane.f32.xlu0 %v2156_v9 }
 0xbfb   : > { %v2158_v27 = vpop.xlane.xlu0 %2157 }
 0xbfc   : > { %v2159_v28 = vmul.f32 0.03125, %v2158_v27 }
 0xbfe   : > { %v2160_v29 = vadd.f32 1e-05, %v2159_v28 }
 0xc00   : > { %3138 = vrsqrt.f32 %v2160_v29 }
 0xc0a   : > { %v3139_v31 = vpop.eup %3138 }
 0xc0b   : > { %v2162_v34 = vmul.f32 %v3139_v31, %v2154_v7 }
 0xc0d   : > { %v2169_v36 = vmul.f32 %v2764_v32, %v2162_v34 }
 0xc0f   : > { %v2176_v4 = vadd.f32 %v2765_v35, %v2169_v36 }
 0xc11   : > { %2940 = vmatmul.mubr.msk.f32.vlgmr.msra.gmra.mrb[16].mxu0 %vm942_vm2, %v2176_v4 }
 0xce4   : > { %v2257_v39 = vpop.f32.mrb[16].mxu0 }
 0xce5   : > { %v2258_v40 = vadd.f32 %v2766_v30, %v2257_v39  ;;  %v2941_v41 = vpop.f32.mrb[17].mxu0 }
 0xce7   : > { %v2261_v42 = vmax.f32 %v2258_v40, 0.0 }
 0xce9   : > { %2959 = vmatmul.mubr.msk.f32.vlgmr.msra.gmra.mrb[14].mxu1 %vm2277_vm4, %v2261_v42 }
 0xdbc   : > { %v2347_v44 = vpop.f32.mrb[14].mxu1 }
 0xdbd   : > { %v2348_v45 = vadd.f32 %v2768_v43, %v2347_v44  ;;  %v2960_v46 = vpop.f32.mrb[15].mxu1 }
 0xdbf   : > { %v2351_v47 = vadd.f32 %v2348_v45, %v2176_v4 }
 0xdc1   : > { %v2354_v48 = vsel %vm942_vm2, %v2351_v47, 0.0 }
 0xdc2   : > { %2355 = vadd.xlane.f32.xlu0 %v2354_v48 }
 0xe4f   : > { %v2356_v49 = vpop.xlane.xlu0 %2355 }
 0xe50   : > { %v2357_v50 = vmul.f32 0.03125, %v2356_v49 }
 0xe52   : > { %v2358_v51 = vsub.f32 %v2351_v47, %v2357_v50 }
 0xe54   : > { %v2359_v52 = vmul.f32 %v2358_v51, %v2358_v51 }
 0xe56   : > { %v2360_v53 = vsel %vm942_vm2, %v2359_v52, 0.0 }
 0xe57   : > { %2361 = vadd.xlane.f32.xlu0 %v2360_v53 }
 0xee4   : > { %v2362_v54 = vpop.xlane.xlu0 %2361 }
 0xee5   : > { %v2363_v55 = vmul.f32 0.03125, %v2362_v54 }
 0xee7   : > { %v2364_v56 = vadd.f32 1e-05, %v2363_v55 }
 0xee9   : > { %3140 = vrsqrt.f32 %v2364_v56 }
 0xef3   : > { %v3141_v57 = vpop.eup %3140 }
 0xef4   : > { %v2366_v59 = vmul.f32 %v3141_v57, %v2358_v51  ;;  %2385 = sbr.rel (%p2772_p11) target bundleno = 3835 (0xefb), region = 108 }
 0xef6   : > { %v2373_v61 = vmul.f32 %v2770_v58, %v2366_v59 }
 0xef8   : > { %v2380_v62 = vadd.f32 %v2771_v60, %v2373_v61 }
 0xefa   : > { %2381 = vst.msk [vmem:[%s3859_s19] sm:$0xff] %vm942_vm2, %v2380_v62 }
 0xefb PF: > { %s4305_s30 = sld [smem:[#allocation20_spill]]  ;;  %s4306_s16 = sld [smem:[#allocation27_spill]] }
 0xefc   : > { %s4307_s12 = sld [smem:[#allocation47_spill]]  ;;  %s2407_s1 = sshll.u32 %s3859_s19, 4  ;;  %s2408_s1 = int_to_ptr.vmem [resolvable:$true] %s2407_s1 }
 0xefd   : > { %s2389_s23 = scalar_lea.sflag [#allocation4], %s3771_s27  ;;  %s3232_s17 = scalar_lea.vmem %s2408_s1, 128 }
 0xefe   : > { %p3233_p3 = scmp.ne.s32.totalorder %s2408_s1, %s3232_s17  ;;  %s3403_s6 = smov [#allocation8]  }
 0xeff   : > { %s3236_s11 = sshll.u32 %s3403_s6, 4  ;;  %s3237_s11 = int_to_ptr.vmem [resolvable:$false] %s3236_s11 }
 0xf00   : > { %s3238_s14 = scalar_lea.vmem %s3237_s11, 256  ;;  %p3239_p13 = scmp.lt.s32.totalorder %s2408_s1, %s3237_s11 }
 0xf01   : > { %s2775_s9 = sshll.u32 %s4305_s30, 7  ;;  %p4308_p9 = scmp.ne.s32.totalorder %s4306_s16, 0 }
 0xf02   : > { %s4087_s15 = scalar_lea.hbm %s4307_s12, %s2775_s9  ;;  %p3240_p12 = scmp.lt.s32.totalorder %s3238_s14, %s3232_s17 }
 0xf03   : > { %p3234_p5 = pnand %p3233_p3, %p4308_p9 }
 0xf04   : > { %p3241_p2 = por %p3240_p12, %p3239_p13 }
 0xf05   : > { %p3235_p8 = pneg %p3234_p5 }
 0xf07   : > { %p3242_p1 = pnand %p3241_p2, %p3235_p8 }
 0xf09   : > { %3245 = shalt.err (!%p3242_p1)
}
 0xf0a   : > { %s3246_s19 = scalar_lea.hbm %s4087_s15, 128  ;;  %s3250_s18 = scalar_lea.hbm %s4307_s12, 256 }
 0xf0b   : > { %p3247_p10 = scmp.ne.s32.totalorder %s4087_s15, %s3246_s19  ;;  %p3251_p7 = scmp.lt.u32.totalorder %s4087_s15, %s4307_s12 }
 0xf0c   : > { %p3252_p4 = scmp.lt.u32.totalorder %s3250_s18, %s3246_s19  ;;  %p3254_p3 = scmp.lt.u32.totalorder %s3246_s19, %s4087_s15 }
 0xf0d   : > { %p3248_p0 = pnand %p3247_p10, %p4308_p9 }
 0xf0e   : > { %p3253_p11 = por %p3252_p4, %p3251_p7 }
 0xf0f   : > { %p3249_p6 = pneg %p3248_p0 }
 0xf10   : > { %p3255_p5 = por %p3254_p3, %p3253_p11 }
 0xf12   : > { %p3256_p8 = pnand %p3255_p5, %p3249_p6 }
 0xf14   : > { %3259 = shalt.err (!%p3256_p8)
}
 0xf15   : > { %3003 = dma.vmem_to_hbm [thread:$0]  (%p4308_p9), %s2408_s1, 128, %s4087_s15, %s2389_s23  }
 0xf16   : > { %s4309_s29 = sld [smem:[#allocation48_spill]]  ;;  %s2420_s3 = sshll.u32 %s860_s21, 4  ;;  %s2421_s3 = int_to_ptr.vmem [resolvable:$true] %s2420_s3 }
 0xf17   : > { %s2394_s10 = scalar_lea.sflag [#allocation10], %s3771_s27  ;;  %s3260_s7 = scalar_lea.vmem %s2421_s3, 128 }
 0xf18   : > { %p3261_p13 = scmp.ne.s32.totalorder %s2421_s3, %s3260_s7  ;;  %s3404_s20 = smov [#allocation9]  }
 0xf19   : > { %s3264_s8 = sshll.u32 %s3404_s20, 4  ;;  %s3265_s8 = int_to_ptr.vmem [resolvable:$false] %s3264_s8 }
 0xf1a   : > { %p3262_p12 = pnand %p3261_p13, %p4308_p9  ;;  %s3266_s2 = scalar_lea.vmem %s3265_s8, 256 }
 0xf1b   : > { %p3267_p1 = scmp.lt.s32.totalorder %s2421_s3, %s3265_s8  ;;  %p3268_p10 = scmp.lt.s32.totalorder %s3266_s2, %s3260_s7 }
 0xf1c   : > { %s4310_s13 = smov %s4309_s29  ;;  %s4113_s24 = scalar_lea.hbm %s4309_s29, %s2775_s9 }
 0xf1d   : > { %p3263_p2 = pneg %p3262_p12  ;;  %p3269_p0 = por %p3268_p10, %p3267_p1 }
 0xf1f   : > { %p3270_p6 = pnand %p3269_p0, %p3263_p2 }
 0xf21   : > { %3273 = shalt.err (!%p3270_p6)
}
 0xf22   : > { %s3274_s27 = scalar_lea.hbm %s4113_s24, 128  ;;  %s3278_s30 = scalar_lea.hbm %s4310_s13, 256 }
 0xf23   : > { %p3275_p7 = scmp.ne.s32.totalorder %s4113_s24, %s3274_s27  ;;  %p3279_p3 = scmp.lt.u32.totalorder %s4113_s24, %s4310_s13 }
 0xf24   : > { %p3280_p5 = scmp.lt.u32.totalorder %s3278_s30, %s3274_s27  ;;  %p3282_p13 = scmp.lt.u32.totalorder %s3274_s27, %s4113_s24 }
 0xf25   : > { %p3276_p4 = pnand %p3275_p7, %p4308_p9 }
 0xf26   : > { %p3281_p8 = por %p3280_p5, %p3279_p3 }
 0xf27   : > { %p3277_p11 = pneg %p3276_p4 }
 0xf28   : > { %p3283_p12 = por %p3282_p13, %p3281_p8 }
 0xf2a   : > { %p3284_p2 = pnand %p3283_p12, %p3277_p11 }
 0xf2c   : > { %3287 = shalt.err (!%p3284_p2)
}
 0xf2d   : > { %3004 = dma.vmem_to_hbm [thread:$0]  (%p4308_p9), %s2421_s3, 128, %s4113_s24, %s2394_s10  }
 0xf2e PF: > { %s4311_s1 = sld [smem:[#allocation23_spill]]  ;;  %s4312_s23 = sld [smem:[#allocation17_spill]] }
 0xf2f   : > { %s4313_s17 = sld [smem:[#allocation29_spill]] }
 0xf34   : > { %p3025_p1 = scmp.ge.s32.totalorder %s4311_s1, 2  ;;  %s2432_s6 = sand.u32 1, %s4312_s23  }
 0xf35   : > { %p4314_p10 = scmp.ne.s32.totalorder %s4313_s17, 0  ;;  %s2433_s11 = scalar_lea.sflag [#allocation4], %s2432_s6 }
 0xf37   : > { %p3018_p0 = pnand %p3025_p1, %p4314_p10 }
 0xf39   : > { %3341 = dma.done.wait (!%p3018_p0), %s2433_s11, 128  }
 0xf3a   : > { %3343 = vsyncadd (!%p3018_p0), %s2433_s11, 4294967168  ;;  %s2442_s14 = scalar_lea.sflag [#allocation10], %s2432_s6 }
 0xf3b   : > { %3345 = dma.done.wait (!%p3018_p0), %s2442_s14, 128  }
 0xf3c   : > { %3347 = vsyncadd (!%p3018_p0), %s2442_s14, 4294967168  ;;  %s41_s2 = sadd.s32 1, %s4311_s1   ;;  %s4315_s27 = sld [smem:[#allocation15_spill]] }
 0xf3d   : > { %p38_p6 = scmp.ge.s32.totalorder %s41_s2, 6   ;;  %s4316_s28 = sld [smem:[#allocation16_spill]] }
 0xf3e   : > { %s4317_s29 = sld [smem:[#allocation25_spill]]  ;;  %s4318_s30 = sld [smem:[#allocation18_spill]] }
 0xf3f   : > { %s4319_s0 = sld [smem:[#allocation19_spill]]  ;;  %s4320_s19 = sld [smem:[#allocation28_spill]] }
 0xf40   : > { %s4321_s1 = sld [smem:[#allocation21_spill]]  ;;  %s4322_s20 = sld [smem:[#allocation22_spill]] }
 0xf41   : > { %s4323_s21 = sld [smem:[#allocation24_spill]]  ;;  %s4324_s22 = sld [smem:[#allocation26_spill]] }
 0xf42   :  { %40 = sbr.rel (!%p38_p6) target bundleno = 33 (0x21), region = 224 }
 0xf49   :  { %2447 = vsyncpa [#allocation3], 1 }
 0xf4a   :  { %2449 = vsyncpa [#allocation3 + $0x1], 1 }
 0xf4b   :  { %2450 = vsyncpa [#allocation6], 1 }
 0xf4c   :  { %2452 = vsyncpa [#allocation6 + $0x1], 1 }
 0xf4d   :  { %2453 = vsyncpa [#allocation4], 1 }
 0xf4e   :  { %2455 = vsyncpa [#allocation4 + $0x1], 1 }
 0xf4f   :  { %2456 = vsyncpa [#allocation10], 1 }
 0xf50   :  { %2458 = vsyncpa [#allocation10 + $0x1], 1 }

</bundles_post_ra>
